<compile_context>
chip_gen: v7x
topology: tpu7x:2x2x1
jax: 0.10.0
libtpu: 0.0.40
codegen_flags: <defaults>
</compile_context>

<pallas_src>
import functools

import jax
import jax.numpy as jnp
from jax import lax
from jax.experimental import pallas as pl
from jax.experimental.pallas import tpu as pltpu


def _round_up(x, m):
    return (x + m - 1) // m * m


def _vmem_capacity_bytes():
    """Best-effort per-core VMEM capacity query; conservative fallback (v7x = 64 MiB)."""
    try:
        info = pltpu.get_tpu_info()
        cap = getattr(info, "vmem_capacity_bytes", None)
        if cap:
            return int(cap)
    except Exception:
        pass
    return 64 << 20


def resblock_kernel(x_ref, w1_ref, w2_ref, bn_ref, o_ref, stk1_ref, stk2_ref,
                    *, K, C_in, C_out, L, N):
    """One grid step over TB batch elements, laid out lane-dense.

    x_ref   : (C_in,  N) f32, N = TB*L (batch segments concatenated along lanes)
    w1_ref  : (C_out, K*C_in)  mm_dtype  (BN2 scale folded in)
    w2_ref  : (C_out, K*C_out) mm_dtype
    bn_ref  : (3, C_out, 1) f32, rows = (BN1 scale, BN1 shift, BN2 shift)
    o_ref   : (C_out, N) f32
    stk*_ref: im2col stacks in mm_dtype; row k*C + c  <->  tap k, channel c
    """
    mm_dtype = stk1_ref.dtype

    s1 = bn_ref[0, :C_in, :]          # (C_in, 1)
    b1 = bn_ref[1, :C_in, :]          # (C_in, 1)
    b2 = bn_ref[2, :, :]              # (C_out, 1)

    # Lane position inside each length-L batch segment (hoisted, computed once).
    lane_in_seg = lax.broadcasted_iota(jnp.int32, (1, N), 1) % L

    def fill_stack(stk_ref, y32, C):
        # Row block k of the stack holds y shifted left by k taps within each batch
        # segment, zero for the last k positions (right-pad 'same' conv).  XLU roll
        # (aligned, full-width) + VALU mask; roll wraparound (incl. across batch
        # segments) lands exactly on the masked lanes.  Cast to the matmul dtype at
        # the store so the stack stays half-size for bf16.
        stk_ref[0:C, :] = y32.astype(mm_dtype)
        for k in range(1, K):
            rolled = pltpu.roll(y32, N - k, 1)   # rolled[:, j] = y32[:, (j + k) % N]
            stk_ref[k * C:(k + 1) * C, :] = (
                jnp.where(lane_in_seg < L - k, rolled, 0.0).astype(mm_dtype))

    # ---- BN1 -> ReLU (Dropout = identity in eval) -> im2col stack #1 ----
    y1 = jnp.maximum(x_ref[...] * s1 + b1, 0.0)
    fill_stack(stk1_ref, y1, C_in)

    # ---- Conv1dSamePadding #1: single MXU matmul, contraction K*C_in ----
    h1 = jnp.dot(w1_ref[...], stk1_ref[...], preferred_element_type=jnp.float32)

    # ---- BN2 shift -> ReLU (Dropout identity) -> im2col stack #2 ----
    y2 = jnp.maximum(h1 + b2, 0.0)
    fill_stack(stk2_ref, y2, C_out)

    # ---- Conv1dSamePadding #2: single MXU matmul, contraction K*C_out ----
    h2 = jnp.dot(w2_ref[...], stk2_ref[...], preferred_element_type=jnp.float32)

    # ---- residual: skip = zero channel-pad of x (MaxPool(k=1, s=1) = identity) ----
    if C_out == C_in:
        o_ref[...] = h2 + x_ref[...]
    else:
        # C_in (padded) is a multiple of the sublane tile -> aligned split stores.
        o_ref[0:C_in, :] = h2[0:C_in, :] + x_ref[...]
        o_ref[C_in:, :] = h2[C_in:, :]


def resblock_forward(x, params, eps=1e-5, *, use_bf16_matmul=False,
                     batch_block=None, min_grid_steps=1):
    """Inference-mode ResBlock forward. x: (B, C_in, L) f32 -> (B, C_out, L) f32.

    min_grid_steps: set to 2 on megacore parts (v7x, 2 TensorCores) so the
    'parallel' batch grid axis has work for both cores; leave at 1 on single-core
    v5e/v6e to maximize the per-step matmul N.
    """
    x = x.astype(jnp.float32)
    B, C_in, L = x.shape
    w1 = params["w1"].astype(jnp.float32)      # (C_out, C_in, K), PyTorch layout
    w2 = params["w2"].astype(jnp.float32)      # (C_out, C_out, K)
    C_out, _, K = w1.shape
    assert C_out >= C_in, "skip path assumes out_channels >= in_channels"
    assert L % 128 == 0, "TODO(synk): pad/mask ragged L and tile L with a K-1 halo"

    mm_dtype = jnp.bfloat16 if use_bf16_matmul else jnp.float32
    mm_bytes = jnp.dtype(mm_dtype).itemsize
    sub = 16 if use_bf16_matmul else 8          # sublane granularity of stack dtype
    C_in_p = _round_up(C_in, sub)
    C_out_p = _round_up(C_out, sub)             # >= C_in_p since C_out >= C_in

    # Fold BatchNorm (inference, running stats) into per-channel scale/shift.
    s1 = params["gamma1"] / jnp.sqrt(params["var1"] + eps)
    b1 = params["beta1"] - params["mean1"] * s1
    s2 = params["gamma2"] / jnp.sqrt(params["var2"] + eps)
    b2 = params["beta2"] - params["mean2"] * s2

    # Lane-dense 2-D weights (tap-major columns: k*C + c), BN2 scale folded into
    # conv1, zeros in the padded-channel positions.
    w1f = jnp.transpose(w1 * s2[:, None, None], (0, 2, 1))          # (C_out, K, C_in)
    w1_2d = jnp.zeros((C_out_p, K, C_in_p), jnp.float32)
    w1_2d = w1_2d.at[:C_out, :, :C_in].set(w1f).reshape(C_out_p, K * C_in_p)
    w2f = jnp.transpose(w2, (0, 2, 1))                               # (C_out, K, C_out)
    w2_2d = jnp.zeros((C_out_p, K, C_out_p), jnp.float32)
    w2_2d = w2_2d.at[:C_out, :, :C_out].set(w2f).reshape(C_out_p, K * C_out_p)
    w1_2d = w1_2d.astype(mm_dtype)
    w2_2d = w2_2d.astype(mm_dtype)

    # All folded BN vectors in one (3, C_out_p, 1) block; padded entries are zero,
    # so padded channels stay exactly zero through BN1 + ReLU.
    bn = jnp.zeros((3, C_out_p), jnp.float32)
    bn = bn.at[0, :C_in].set(s1).at[1, :C_in].set(b1).at[2, :C_out].set(b2)
    bn = bn.reshape(3, C_out_p, 1)

    # Lane-dense activation slab: (C_in_p, B*L); column b*L + l  <->  x[b, :, l].
    x_p = jnp.pad(x, ((0, 0), (0, C_in_p - C_in), (0, 0)))
    x_t = jnp.transpose(x_p, (1, 0, 2)).reshape(C_in_p, B * L)

    # --- batch tile: budget against the full VMEM footprint of one grid step ---
    def footprint(tb):
        n = tb * L
        f = 2 * C_in_p * n * 4                                    # x block (2x buffered)
        f += 2 * C_out_p * n * 4                                  # out block (2x buffered)
        f += 2 * (w1_2d.size + w2_2d.size) * mm_bytes + 2 * bn.size * 4
        f += K * C_in_p * n * mm_bytes                            # im2col stack #1
        f += K * C_out_p * n * mm_bytes                           # im2col stack #2
        f += 4 * C_out_p * n * 4                                  # h1/y2/h2/roll temps
        return f

    vmem_cap = _vmem_capacity_bytes()
    budget = vmem_cap // 2
    if batch_block is None:
        batch_block = 1
        for d in range(1, B + 1):
            if B % d != 0:
                continue
            if B // d < min_grid_steps:
                break
            if footprint(d) <= budget:
                batch_block = d
    TB = batch_block
    assert B % TB == 0
    N = TB * L
    vmem_limit = int(min(vmem_cap * 0.9, max(2 * footprint(TB), 32 << 20)))

    kernel = functools.partial(resblock_kernel, K=K, C_in=C_in_p, C_out=C_out_p,
                               L=L, N=N)
    cost = pl.CostEstimate(
        flops=2 * B * L * K * C_out_p * (C_in_p + C_out_p),
        transcendentals=0,
        bytes_accessed=(x_t.size * 4 + (w1_2d.size + w2_2d.size) * mm_bytes
                        + bn.size * 4 + C_out_p * B * L * 4),
    )

    out_t = pl.pallas_call(
        kernel,
        out_shape=jax.ShapeDtypeStruct((C_out_p, B * L), jnp.float32),
        grid=(B // TB,),
        in_specs=[
            pl.BlockSpec((C_in_p, N), lambda g: (0, g)),             # x slab
            pl.BlockSpec((C_out_p, K * C_in_p), lambda g: (0, 0)),   # conv1 weights (2-D)
            pl.BlockSpec((C_out_p, K * C_out_p), lambda g: (0, 0)),  # conv2 weights (2-D)
            pl.BlockSpec((3, C_out_p, 1), lambda g: (0, 0, 0)),      # folded BN params
        ],
        out_specs=pl.BlockSpec((C_out_p, N), lambda g: (0, g)),
        scratch_shapes=[
            pltpu.VMEM((K * C_in_p, N), mm_dtype),    # im2col stack, conv1
            pltpu.VMEM((K * C_out_p, N), mm_dtype),   # im2col stack, conv2
        ],
        compiler_params=pltpu.CompilerParams(
            dimension_semantics=("parallel",),
            vmem_limit_bytes=vmem_limit),
        cost_estimate=cost,
    )(x_t, w1_2d, w2_2d, bn)

    # Back to PyTorch NCL layout; drop padded output channels.
    out = out_t.reshape(C_out_p, B, L).transpose(1, 0, 2)
    return out[:, :C_out, :]


# ---------------- pure-JAX reference (for correctness check) ----------------
def _conv1d_same_right_pad(y, w):
    K = w.shape[-1]
    yp = jnp.pad(y, ((0, 0), (0, 0), (0, K - 1)))
    return jax.lax.conv_general_dilated(
        yp, w, window_strides=(1,), padding="VALID",
        dimension_numbers=("NCH", "OIH", "NCH"))


def resblock_reference(x, params, eps=1e-5):
    C_out = params["w1"].shape[0]
    C_in = params["w1"].shape[1]
    bn1 = (x - params["mean1"][None, :, None]) / jnp.sqrt(
        params["var1"][None, :, None] + eps)
    bn1 = bn1 * params["gamma1"][None, :, None] + params["beta1"][None, :, None]
    h = _conv1d_same_right_pad(jnp.maximum(bn1, 0.0), params["w1"])
    bn2 = (h - params["mean2"][None, :, None]) / jnp.sqrt(
        params["var2"][None, :, None] + eps)
    bn2 = bn2 * params["gamma2"][None, :, None] + params["beta2"][None, :, None]
    h = _conv1d_same_right_pad(jnp.maximum(bn2, 0.0), params["w2"])
    skip = jnp.pad(x, ((0, 0), (0, C_out - C_in), (0, 0)))
    return h + skip


if __name__ == "__main__":
    B, C_in, C_out, L, K = 4, 4, 8, 128, 16

    key = jax.random.PRNGKey(0)
    ks = jax.random.split(key, 9)
    params = {
        "w1": jax.random.normal(ks[0], (C_out, C_in, K), jnp.float32) * 0.1,
        "w2": jax.random.normal(ks[1], (C_out, C_out, K), jnp.float32) * 0.1,
        "gamma1": 1.0 + 0.1 * jax.random.normal(ks[2], (C_in,), jnp.float32),
        "beta1": 0.1 * jax.random.normal(ks[3], (C_in,), jnp.float32),
        "mean1": 0.1 * jax.random.normal(ks[4], (C_in,), jnp.float32),
        "var1": jax.random.uniform(ks[5], (C_in,), jnp.float32, 0.5, 1.5),
        "gamma2": 1.0 + 0.1 * jax.random.normal(ks[6], (C_out,), jnp.float32),
        "beta2": 0.1 * jax.random.normal(ks[7], (C_out,), jnp.float32),
        "mean2": jnp.zeros((C_out,), jnp.float32),
        "var2": jnp.ones((C_out,), jnp.float32),
    }
    x = jax.random.normal(ks[8], (B, C_in, L), jnp.float32)

    ref = jax.block_until_ready(resblock_reference(x, params))

    # f32 path (exact-semantics check, tight tolerance), single grid step.
    out = jax.block_until_ready(resblock_forward(x, params))
    assert out.shape == (B, C_out, L)
    assert jnp.allclose(out, ref, rtol=1e-4, atol=1e-4), \
        f"f32 max abs err {jnp.max(jnp.abs(out - ref))}"

    # bf16-MXU-operand path (bf16 stacks/weights, f32 accumulation), looser tol.
    out_bf16 = jax.block_until_ready(resblock_forward(x, params, use_bf16_matmul=True))
    assert out_bf16.shape == (B, C_out, L)
    assert jnp.allclose(out_bf16, ref, rtol=5e-2, atol=5e-2), \
        f"bf16 max abs err {jnp.max(jnp.abs(out_bf16 - ref))}"

    # Multi-step grid path (what a megacore / v7x config would use).
    out_ms = jax.block_until_ready(resblock_forward(x, params, min_grid_steps=2))
    assert jnp.allclose(out_ms, ref, rtol=1e-4, atol=1e-4), \
        f"multi-step max abs err {jnp.max(jnp.abs(out_ms - ref))}"

    print("KERNEL_OK")
</pallas_src>

<mosaic_0001>
module attributes {stable_mosaic.version = 11 : i64} {
  func.func @resblock_kernel(%arg0: i32, %arg1: memref<8x512xf32, #tpu.memory_space<vmem>>, %arg2: memref<8x128xf32, #tpu.memory_space<vmem>>, %arg3: memref<8x128xf32, #tpu.memory_space<vmem>>, %arg4: memref<3x8x1xf32, #tpu.memory_space<vmem>>, %arg5: memref<8x512xf32, #tpu.memory_space<vmem>>, %arg6: memref<128x512xf32, #tpu.memory_space<vmem>>, %arg7: memref<128x512xf32, #tpu.memory_space<vmem>>) attributes {dimension_semantics = [#tpu.dimension_semantics<parallel>], iteration_bounds = array<i64: 1>, scalar_prefetch = 0 : i64, scratch_operands = 2 : i64, tpu.core_type = #tpu.core_type<tc>, window_params = [{transform_indices = @transform_0, window_bounds = array<i64: 8, 512>}, {pipeline_mode = #tpu.pipeline_mode<synchronous>, transform_indices = @transform_1, window_bounds = array<i64: 8, 128>}, {pipeline_mode = #tpu.pipeline_mode<synchronous>, transform_indices = @transform_2, window_bounds = array<i64: 8, 128>}, {pipeline_mode = #tpu.pipeline_mode<synchronous>, transform_indices = @transform_3, window_bounds = array<i64: 3, 8, 1>}, {transform_indices = @transform_4, window_bounds = array<i64: 8, 512>}]} {
    %c0 = arith.constant 0 : index
    %c0_0 = arith.constant 0 : index
    %c0_1 = arith.constant 0 : index
    %0 = vector.load %arg4[%c0, %c0_0, %c0_1] : memref<3x8x1xf32, #tpu.memory_space<vmem>>, vector<1x8x1xf32>
    %1 = vector.shape_cast %0 : vector<1x8x1xf32> to vector<8x1xf32>
    %c1 = arith.constant 1 : index
    %c0_2 = arith.constant 0 : index
    %c0_3 = arith.constant 0 : index
    %2 = vector.load %arg4[%c1, %c0_2, %c0_3] : memref<3x8x1xf32, #tpu.memory_space<vmem>>, vector<1x8x1xf32>
    %3 = vector.shape_cast %2 : vector<1x8x1xf32> to vector<8x1xf32>
    %c2 = arith.constant 2 : index
    %c0_4 = arith.constant 0 : index
    %c0_5 = arith.constant 0 : index
    %4 = vector.load %arg4[%c2, %c0_4, %c0_5] : memref<3x8x1xf32, #tpu.memory_space<vmem>>, vector<1x8x1xf32>
    %5 = vector.shape_cast %4 : vector<1x8x1xf32> to vector<8x1xf32>
    %6 = tpu.iota {dimensions = array<i32: 1>} : vector<1x512xi32>
    %c128_i32 = arith.constant 128 : i32
    %c0_i32 = arith.constant 0 : i32
    %7 = arith.cmpi eq, %c128_i32, %c0_i32 : i32
    %c1_i32 = arith.constant 1 : i32
    %8 = arith.select %7, %c1_i32, %c128_i32 : i32
    %9 = vector.broadcast %8 : i32 to vector<1x512xi32>
    %10 = arith.remsi %6, %9 : vector<1x512xi32>
    %c0_i32_6 = arith.constant 0 : i32
    %11 = vector.broadcast %c0_i32_6 : i32 to vector<1x512xi32>
    %12 = arith.cmpi ne, %10, %11 : vector<1x512xi32>
    %c0_i32_7 = arith.constant 0 : i32
    %13 = vector.broadcast %c0_i32_7 : i32 to vector<1x512xi32>
    %14 = arith.cmpi slt, %10, %13 : vector<1x512xi32>
    %c0_i32_8 = arith.constant 0 : i32
    %15 = arith.cmpi slt, %8, %c0_i32_8 : i32
    %16 = vector.broadcast %15 : i1 to vector<1x512xi1>
    %17 = vector.broadcast %16 : vector<1x512xi1> to vector<1x512xi1>
    %18 = arith.xori %14, %17 : vector<1x512xi1>
    %19 = arith.andi %18, %12 : vector<1x512xi1>
    %20 = vector.broadcast %8 : i32 to vector<1x512xi32>
    %21 = arith.addi %10, %20 : vector<1x512xi32>
    %22 = arith.select %19, %21, %10 : vector<1x512xi1>, vector<1x512xi32>
    %c0_9 = arith.constant 0 : index
    %c0_10 = arith.constant 0 : index
    %23 = vector.load %arg1[%c0_9, %c0_10] : memref<8x512xf32, #tpu.memory_space<vmem>>, vector<8x512xf32>
    %24 = vector.broadcast %1 : vector<8x1xf32> to vector<8x512xf32>
    %25 = arith.mulf %23, %24 : vector<8x512xf32>
    %26 = vector.broadcast %3 : vector<8x1xf32> to vector<8x512xf32>
    %27 = arith.addf %25, %26 : vector<8x512xf32>
    %cst = arith.constant 0.000000e+00 : f32
    %28 = vector.broadcast %cst : f32 to vector<8x512xf32>
    %29 = arith.maximumf %27, %28 : vector<8x512xf32>
    %c0_11 = arith.constant 0 : index
    %c0_12 = arith.constant 0 : index
    %30 = vector.load %arg6[%c0_11, %c0_12] : memref<128x512xf32, #tpu.memory_space<vmem>>, vector<8x512xf32>
    tpu.vector_store %arg6[%c0_11, %c0_12], %29 {strides = array<i32>} : memref<128x512xf32, #tpu.memory_space<vmem>>, vector<8x512xf32>,
    %c511_i32 = arith.constant 511 : i32
    %31 = tpu.dynamic_rotate %29 by %c511_i32 dim 1 : vector<8x512xf32>, i32 -> vector<8x512xf32>
    %c127_i32 = arith.constant 127 : i32
    %32 = vector.broadcast %c127_i32 : i32 to vector<1x512xi32>
    %33 = arith.cmpi slt, %22, %32 : vector<1x512xi32>
    %cst_13 = arith.constant 0.000000e+00 : f32
    %34 = vector.shape_cast %33 : vector<1x512xi1> to vector<1x512xi1>
    %35 = vector.broadcast %34 : vector<1x512xi1> to vector<8x512xi1>
    %36 = vector.broadcast %cst_13 : f32 to vector<8x512xf32>
    %37 = arith.select %35, %31, %36 : vector<8x512xi1>, vector<8x512xf32>
    %c8 = arith.constant 8 : index
    %c0_14 = arith.constant 0 : index
    %38 = vector.load %arg6[%c8, %c0_14] : memref<128x512xf32, #tpu.memory_space<vmem>>, vector<8x512xf32>
    tpu.vector_store %arg6[%c8, %c0_14], %37 {strides = array<i32>} : memref<128x512xf32, #tpu.memory_space<vmem>>, vector<8x512xf32>,
    %c510_i32 = arith.constant 510 : i32
    %39 = tpu.dynamic_rotate %29 by %c510_i32 dim 1 : vector<8x512xf32>, i32 -> vector<8x512xf32>
    %c126_i32 = arith.constant 126 : i32
    %40 = vector.broadcast %c126_i32 : i32 to vector<1x512xi32>
    %41 = arith.cmpi slt, %22, %40 : vector<1x512xi32>
    %cst_15 = arith.constant 0.000000e+00 : f32
    %42 = vector.shape_cast %41 : vector<1x512xi1> to vector<1x512xi1>
    %43 = vector.broadcast %42 : vector<1x512xi1> to vector<8x512xi1>
    %44 = vector.broadcast %cst_15 : f32 to vector<8x512xf32>
    %45 = arith.select %43, %39, %44 : vector<8x512xi1>, vector<8x512xf32>
    %c16 = arith.constant 16 : index
    %c0_16 = arith.constant 0 : index
    %46 = vector.load %arg6[%c16, %c0_16] : memref<128x512xf32, #tpu.memory_space<vmem>>, vector<8x512xf32>
    tpu.vector_store %arg6[%c16, %c0_16], %45 {strides = array<i32>} : memref<128x512xf32, #tpu.memory_space<vmem>>, vector<8x512xf32>,
    %c509_i32 = arith.constant 509 : i32
    %47 = tpu.dynamic_rotate %29 by %c509_i32 dim 1 : vector<8x512xf32>, i32 -> vector<8x512xf32>
    %c125_i32 = arith.constant 125 : i32
    %48 = vector.broadcast %c125_i32 : i32 to vector<1x512xi32>
    %49 = arith.cmpi slt, %22, %48 : vector<1x512xi32>
    %cst_17 = arith.constant 0.000000e+00 : f32
    %50 = vector.shape_cast %49 : vector<1x512xi1> to vector<1x512xi1>
    %51 = vector.broadcast %50 : vector<1x512xi1> to vector<8x512xi1>
    %52 = vector.broadcast %cst_17 : f32 to vector<8x512xf32>
    %53 = arith.select %51, %47, %52 : vector<8x512xi1>, vector<8x512xf32>
    %c24 = arith.constant 24 : index
    %c0_18 = arith.constant 0 : index
    %54 = vector.load %arg6[%c24, %c0_18] : memref<128x512xf32, #tpu.memory_space<vmem>>, vector<8x512xf32>
    tpu.vector_store %arg6[%c24, %c0_18], %53 {strides = array<i32>} : memref<128x512xf32, #tpu.memory_space<vmem>>, vector<8x512xf32>,
    %c508_i32 = arith.constant 508 : i32
    %55 = tpu.dynamic_rotate %29 by %c508_i32 dim 1 : vector<8x512xf32>, i32 -> vector<8x512xf32>
    %c124_i32 = arith.constant 124 : i32
    %56 = vector.broadcast %c124_i32 : i32 to vector<1x512xi32>
    %57 = arith.cmpi slt, %22, %56 : vector<1x512xi32>
    %cst_19 = arith.constant 0.000000e+00 : f32
    %58 = vector.shape_cast %57 : vector<1x512xi1> to vector<1x512xi1>
    %59 = vector.broadcast %58 : vector<1x512xi1> to vector<8x512xi1>
    %60 = vector.broadcast %cst_19 : f32 to vector<8x512xf32>
    %61 = arith.select %59, %55, %60 : vector<8x512xi1>, vector<8x512xf32>
    %c32 = arith.constant 32 : index
    %c0_20 = arith.constant 0 : index
    %62 = vector.load %arg6[%c32, %c0_20] : memref<128x512xf32, #tpu.memory_space<vmem>>, vector<8x512xf32>
    tpu.vector_store %arg6[%c32, %c0_20], %61 {strides = array<i32>} : memref<128x512xf32, #tpu.memory_space<vmem>>, vector<8x512xf32>,
    %c507_i32 = arith.constant 507 : i32
    %63 = tpu.dynamic_rotate %29 by %c507_i32 dim 1 : vector<8x512xf32>, i32 -> vector<8x512xf32>
    %c123_i32 = arith.constant 123 : i32
    %64 = vector.broadcast %c123_i32 : i32 to vector<1x512xi32>
    %65 = arith.cmpi slt, %22, %64 : vector<1x512xi32>
    %cst_21 = arith.constant 0.000000e+00 : f32
    %66 = vector.shape_cast %65 : vector<1x512xi1> to vector<1x512xi1>
    %67 = vector.broadcast %66 : vector<1x512xi1> to vector<8x512xi1>
    %68 = vector.broadcast %cst_21 : f32 to vector<8x512xf32>
    %69 = arith.select %67, %63, %68 : vector<8x512xi1>, vector<8x512xf32>
    %c40 = arith.constant 40 : index
    %c0_22 = arith.constant 0 : index
    %70 = vector.load %arg6[%c40, %c0_22] : memref<128x512xf32, #tpu.memory_space<vmem>>, vector<8x512xf32>
    tpu.vector_store %arg6[%c40, %c0_22], %69 {strides = array<i32>} : memref<128x512xf32, #tpu.memory_space<vmem>>, vector<8x512xf32>,
    %c506_i32 = arith.constant 506 : i32
    %71 = tpu.dynamic_rotate %29 by %c506_i32 dim 1 : vector<8x512xf32>, i32 -> vector<8x512xf32>
    %c122_i32 = arith.constant 122 : i32
    %72 = vector.broadcast %c122_i32 : i32 to vector<1x512xi32>
    %73 = arith.cmpi slt, %22, %72 : vector<1x512xi32>
    %cst_23 = arith.constant 0.000000e+00 : f32
    %74 = vector.shape_cast %73 : vector<1x512xi1> to vector<1x512xi1>
    %75 = vector.broadcast %74 : vector<1x512xi1> to vector<8x512xi1>
    %76 = vector.broadcast %cst_23 : f32 to vector<8x512xf32>
    %77 = arith.select %75, %71, %76 : vector<8x512xi1>, vector<8x512xf32>
    %c48 = arith.constant 48 : index
    %c0_24 = arith.constant 0 : index
    %78 = vector.load %arg6[%c48, %c0_24] : memref<128x512xf32, #tpu.memory_space<vmem>>, vector<8x512xf32>
    tpu.vector_store %arg6[%c48, %c0_24], %77 {strides = array<i32>} : memref<128x512xf32, #tpu.memory_space<vmem>>, vector<8x512xf32>,
    %c505_i32 = arith.constant 505 : i32
    %79 = tpu.dynamic_rotate %29 by %c505_i32 dim 1 : vector<8x512xf32>, i32 -> vector<8x512xf32>
    %c121_i32 = arith.constant 121 : i32
    %80 = vector.broadcast %c121_i32 : i32 to vector<1x512xi32>
    %81 = arith.cmpi slt, %22, %80 : vector<1x512xi32>
    %cst_25 = arith.constant 0.000000e+00 : f32
    %82 = vector.shape_cast %81 : vector<1x512xi1> to vector<1x512xi1>
    %83 = vector.broadcast %82 : vector<1x512xi1> to vector<8x512xi1>
    %84 = vector.broadcast %cst_25 : f32 to vector<8x512xf32>
    %85 = arith.select %83, %79, %84 : vector<8x512xi1>, vector<8x512xf32>
    %c56 = arith.constant 56 : index
    %c0_26 = arith.constant 0 : index
    %86 = vector.load %arg6[%c56, %c0_26] : memref<128x512xf32, #tpu.memory_space<vmem>>, vector<8x512xf32>
    tpu.vector_store %arg6[%c56, %c0_26], %85 {strides = array<i32>} : memref<128x512xf32, #tpu.memory_space<vmem>>, vector<8x512xf32>,
    %c504_i32 = arith.constant 504 : i32
    %87 = tpu.dynamic_rotate %29 by %c504_i32 dim 1 : vector<8x512xf32>, i32 -> vector<8x512xf32>
    %c120_i32 = arith.constant 120 : i32
    %88 = vector.broadcast %c120_i32 : i32 to vector<1x512xi32>
    %89 = arith.cmpi slt, %22, %88 : vector<1x512xi32>
    %cst_27 = arith.constant 0.000000e+00 : f32
    %90 = vector.shape_cast %89 : vector<1x512xi1> to vector<1x512xi1>
    %91 = vector.broadcast %90 : vector<1x512xi1> to vector<8x512xi1>
    %92 = vector.broadcast %cst_27 : f32 to vector<8x512xf32>
    %93 = arith.select %91, %87, %92 : vector<8x512xi1>, vector<8x512xf32>
    %c64 = arith.constant 64 : index
    %c0_28 = arith.constant 0 : index
    %94 = vector.load %arg6[%c64, %c0_28] : memref<128x512xf32, #tpu.memory_space<vmem>>, vector<8x512xf32>
    tpu.vector_store %arg6[%c64, %c0_28], %93 {strides = array<i32>} : memref<128x512xf32, #tpu.memory_space<vmem>>, vector<8x512xf32>,
    %c503_i32 = arith.constant 503 : i32
    %95 = tpu.dynamic_rotate %29 by %c503_i32 dim 1 : vector<8x512xf32>, i32 -> vector<8x512xf32>
    %c119_i32 = arith.constant 119 : i32
    %96 = vector.broadcast %c119_i32 : i32 to vector<1x512xi32>
    %97 = arith.cmpi slt, %22, %96 : vector<1x512xi32>
    %cst_29 = arith.constant 0.000000e+00 : f32
    %98 = vector.shape_cast %97 : vector<1x512xi1> to vector<1x512xi1>
    %99 = vector.broadcast %98 : vector<1x512xi1> to vector<8x512xi1>
    %100 = vector.broadcast %cst_29 : f32 to vector<8x512xf32>
    %101 = arith.select %99, %95, %100 : vector<8x512xi1>, vector<8x512xf32>
    %c72 = arith.constant 72 : index
    %c0_30 = arith.constant 0 : index
    %102 = vector.load %arg6[%c72, %c0_30] : memref<128x512xf32, #tpu.memory_space<vmem>>, vector<8x512xf32>
    tpu.vector_store %arg6[%c72, %c0_30], %101 {strides = array<i32>} : memref<128x512xf32, #tpu.memory_space<vmem>>, vector<8x512xf32>,
    %c502_i32 = arith.constant 502 : i32
    %103 = tpu.dynamic_rotate %29 by %c502_i32 dim 1 : vector<8x512xf32>, i32 -> vector<8x512xf32>
    %c118_i32 = arith.constant 118 : i32
    %104 = vector.broadcast %c118_i32 : i32 to vector<1x512xi32>
    %105 = arith.cmpi slt, %22, %104 : vector<1x512xi32>
    %cst_31 = arith.constant 0.000000e+00 : f32
    %106 = vector.shape_cast %105 : vector<1x512xi1> to vector<1x512xi1>
    %107 = vector.broadcast %106 : vector<1x512xi1> to vector<8x512xi1>
    %108 = vector.broadcast %cst_31 : f32 to vector<8x512xf32>
    %109 = arith.select %107, %103, %108 : vector<8x512xi1>, vector<8x512xf32>
    %c80 = arith.constant 80 : index
    %c0_32 = arith.constant 0 : index
    %110 = vector.load %arg6[%c80, %c0_32] : memref<128x512xf32, #tpu.memory_space<vmem>>, vector<8x512xf32>
    tpu.vector_store %arg6[%c80, %c0_32], %109 {strides = array<i32>} : memref<128x512xf32, #tpu.memory_space<vmem>>, vector<8x512xf32>,
    %c501_i32 = arith.constant 501 : i32
    %111 = tpu.dynamic_rotate %29 by %c501_i32 dim 1 : vector<8x512xf32>, i32 -> vector<8x512xf32>
    %c117_i32 = arith.constant 117 : i32
    %112 = vector.broadcast %c117_i32 : i32 to vector<1x512xi32>
    %113 = arith.cmpi slt, %22, %112 : vector<1x512xi32>
    %cst_33 = arith.constant 0.000000e+00 : f32
    %114 = vector.shape_cast %113 : vector<1x512xi1> to vector<1x512xi1>
    %115 = vector.broadcast %114 : vector<1x512xi1> to vector<8x512xi1>
    %116 = vector.broadcast %cst_33 : f32 to vector<8x512xf32>
    %117 = arith.select %115, %111, %116 : vector<8x512xi1>, vector<8x512xf32>
    %c88 = arith.constant 88 : index
    %c0_34 = arith.constant 0 : index
    %118 = vector.load %arg6[%c88, %c0_34] : memref<128x512xf32, #tpu.memory_space<vmem>>, vector<8x512xf32>
    tpu.vector_store %arg6[%c88, %c0_34], %117 {strides = array<i32>} : memref<128x512xf32, #tpu.memory_space<vmem>>, vector<8x512xf32>,
    %c500_i32 = arith.constant 500 : i32
    %119 = tpu.dynamic_rotate %29 by %c500_i32 dim 1 : vector<8x512xf32>, i32 -> vector<8x512xf32>
    %c116_i32 = arith.constant 116 : i32
    %120 = vector.broadcast %c116_i32 : i32 to vector<1x512xi32>
    %121 = arith.cmpi slt, %22, %120 : vector<1x512xi32>
    %cst_35 = arith.constant 0.000000e+00 : f32
    %122 = vector.shape_cast %121 : vector<1x512xi1> to vector<1x512xi1>
    %123 = vector.broadcast %122 : vector<1x512xi1> to vector<8x512xi1>
    %124 = vector.broadcast %cst_35 : f32 to vector<8x512xf32>
    %125 = arith.select %123, %119, %124 : vector<8x512xi1>, vector<8x512xf32>
    %c96 = arith.constant 96 : index
    %c0_36 = arith.constant 0 : index
    %126 = vector.load %arg6[%c96, %c0_36] : memref<128x512xf32, #tpu.memory_space<vmem>>, vector<8x512xf32>
    tpu.vector_store %arg6[%c96, %c0_36], %125 {strides = array<i32>} : memref<128x512xf32, #tpu.memory_space<vmem>>, vector<8x512xf32>,
    %c499_i32 = arith.constant 499 : i32
    %127 = tpu.dynamic_rotate %29 by %c499_i32 dim 1 : vector<8x512xf32>, i32 -> vector<8x512xf32>
    %c115_i32 = arith.constant 115 : i32
    %128 = vector.broadcast %c115_i32 : i32 to vector<1x512xi32>
    %129 = arith.cmpi slt, %22, %128 : vector<1x512xi32>
    %cst_37 = arith.constant 0.000000e+00 : f32
    %130 = vector.shape_cast %129 : vector<1x512xi1> to vector<1x512xi1>
    %131 = vector.broadcast %130 : vector<1x512xi1> to vector<8x512xi1>
    %132 = vector.broadcast %cst_37 : f32 to vector<8x512xf32>
    %133 = arith.select %131, %127, %132 : vector<8x512xi1>, vector<8x512xf32>
    %c104 = arith.constant 104 : index
    %c0_38 = arith.constant 0 : index
    %134 = vector.load %arg6[%c104, %c0_38] : memref<128x512xf32, #tpu.memory_space<vmem>>, vector<8x512xf32>
    tpu.vector_store %arg6[%c104, %c0_38], %133 {strides = array<i32>} : memref<128x512xf32, #tpu.memory_space<vmem>>, vector<8x512xf32>,
    %c498_i32 = arith.constant 498 : i32
    %135 = tpu.dynamic_rotate %29 by %c498_i32 dim 1 : vector<8x512xf32>, i32 -> vector<8x512xf32>
    %c114_i32 = arith.constant 114 : i32
    %136 = vector.broadcast %c114_i32 : i32 to vector<1x512xi32>
    %137 = arith.cmpi slt, %22, %136 : vector<1x512xi32>
    %cst_39 = arith.constant 0.000000e+00 : f32
    %138 = vector.shape_cast %137 : vector<1x512xi1> to vector<1x512xi1>
    %139 = vector.broadcast %138 : vector<1x512xi1> to vector<8x512xi1>
    %140 = vector.broadcast %cst_39 : f32 to vector<8x512xf32>
    %141 = arith.select %139, %135, %140 : vector<8x512xi1>, vector<8x512xf32>
    %c112 = arith.constant 112 : index
    %c0_40 = arith.constant 0 : index
    %142 = vector.load %arg6[%c112, %c0_40] : memref<128x512xf32, #tpu.memory_space<vmem>>, vector<8x512xf32>
    tpu.vector_store %arg6[%c112, %c0_40], %141 {strides = array<i32>} : memref<128x512xf32, #tpu.memory_space<vmem>>, vector<8x512xf32>,
    %c497_i32 = arith.constant 497 : i32
    %143 = tpu.dynamic_rotate %29 by %c497_i32 dim 1 : vector<8x512xf32>, i32 -> vector<8x512xf32>
    %c113_i32 = arith.constant 113 : i32
    %144 = vector.broadcast %c113_i32 : i32 to vector<1x512xi32>
    %145 = arith.cmpi slt, %22, %144 : vector<1x512xi32>
    %cst_41 = arith.constant 0.000000e+00 : f32
    %146 = vector.shape_cast %145 : vector<1x512xi1> to vector<1x512xi1>
    %147 = vector.broadcast %146 : vector<1x512xi1> to vector<8x512xi1>
    %148 = vector.broadcast %cst_41 : f32 to vector<8x512xf32>
    %149 = arith.select %147, %143, %148 : vector<8x512xi1>, vector<8x512xf32>
    %c120 = arith.constant 120 : index
    %c0_42 = arith.constant 0 : index
    %150 = vector.load %arg6[%c120, %c0_42] : memref<128x512xf32, #tpu.memory_space<vmem>>, vector<8x512xf32>
    tpu.vector_store %arg6[%c120, %c0_42], %149 {strides = array<i32>} : memref<128x512xf32, #tpu.memory_space<vmem>>, vector<8x512xf32>,
    %c0_43 = arith.constant 0 : index
    %c0_44 = arith.constant 0 : index
    %151 = vector.load %arg2[%c0_43, %c0_44] : memref<8x128xf32, #tpu.memory_space<vmem>>, vector<8x128xf32>
    %c0_45 = arith.constant 0 : index
    %c0_46 = arith.constant 0 : index
    %152 = vector.load %arg6[%c0_45, %c0_46] : memref<128x512xf32, #tpu.memory_space<vmem>>, vector<128x512xf32>
    %cst_47 = arith.constant dense<0.000000e+00> : vector<8x512xf32>
    %153 = tpu.matmul %151, %152, %cst_47 {dimension_numbers = #tpu.dot_dimension_numbers<[1], [0], [0], [1], [0, 0, 1, 1], [], []>} : vector<8x128xf32>, vector<128x512xf32>, vector<8x512xf32> -> vector<8x512xf32>
    %154 = vector.broadcast %5 : vector<8x1xf32> to vector<8x512xf32>
    %155 = arith.addf %153, %154 : vector<8x512xf32>
    %cst_48 = arith.constant 0.000000e+00 : f32
    %156 = vector.broadcast %cst_48 : f32 to vector<8x512xf32>
    %157 = arith.maximumf %155, %156 : vector<8x512xf32>
    %c0_49 = arith.constant 0 : index
    %c0_50 = arith.constant 0 : index
    %158 = vector.load %arg7[%c0_49, %c0_50] : memref<128x512xf32, #tpu.memory_space<vmem>>, vector<8x512xf32>
    tpu.vector_store %arg7[%c0_49, %c0_50], %157 {strides = array<i32>} : memref<128x512xf32, #tpu.memory_space<vmem>>, vector<8x512xf32>,
    %c511_i32_51 = arith.constant 511 : i32
    %159 = tpu.dynamic_rotate %157 by %c511_i32_51 dim 1 : vector<8x512xf32>, i32 -> vector<8x512xf32>
    %c127_i32_52 = arith.constant 127 : i32
    %160 = vector.broadcast %c127_i32_52 : i32 to vector<1x512xi32>
    %161 = arith.cmpi slt, %22, %160 : vector<1x512xi32>
    %cst_53 = arith.constant 0.000000e+00 : f32
    %162 = vector.shape_cast %161 : vector<1x512xi1> to vector<1x512xi1>
    %163 = vector.broadcast %162 : vector<1x512xi1> to vector<8x512xi1>
    %164 = vector.broadcast %cst_53 : f32 to vector<8x512xf32>
    %165 = arith.select %163, %159, %164 : vector<8x512xi1>, vector<8x512xf32>
    %c8_54 = arith.constant 8 : index
    %c0_55 = arith.constant 0 : index
    %166 = vector.load %arg7[%c8_54, %c0_55] : memref<128x512xf32, #tpu.memory_space<vmem>>, vector<8x512xf32>
    tpu.vector_store %arg7[%c8_54, %c0_55], %165 {strides = array<i32>} : memref<128x512xf32, #tpu.memory_space<vmem>>, vector<8x512xf32>,
    %c510_i32_56 = arith.constant 510 : i32
    %167 = tpu.dynamic_rotate %157 by %c510_i32_56 dim 1 : vector<8x512xf32>, i32 -> vector<8x512xf32>
    %c126_i32_57 = arith.constant 126 : i32
    %168 = vector.broadcast %c126_i32_57 : i32 to vector<1x512xi32>
    %169 = arith.cmpi slt, %22, %168 : vector<1x512xi32>
    %cst_58 = arith.constant 0.000000e+00 : f32
    %170 = vector.shape_cast %169 : vector<1x512xi1> to vector<1x512xi1>
    %171 = vector.broadcast %170 : vector<1x512xi1> to vector<8x512xi1>
    %172 = vector.broadcast %cst_58 : f32 to vector<8x512xf32>
    %173 = arith.select %171, %167, %172 : vector<8x512xi1>, vector<8x512xf32>
    %c16_59 = arith.constant 16 : index
    %c0_60 = arith.constant 0 : index
    %174 = vector.load %arg7[%c16_59, %c0_60] : memref<128x512xf32, #tpu.memory_space<vmem>>, vector<8x512xf32>
    tpu.vector_store %arg7[%c16_59, %c0_60], %173 {strides = array<i32>} : memref<128x512xf32, #tpu.memory_space<vmem>>, vector<8x512xf32>,
    %c509_i32_61 = arith.constant 509 : i32
    %175 = tpu.dynamic_rotate %157 by %c509_i32_61 dim 1 : vector<8x512xf32>, i32 -> vector<8x512xf32>
    %c125_i32_62 = arith.constant 125 : i32
    %176 = vector.broadcast %c125_i32_62 : i32 to vector<1x512xi32>
    %177 = arith.cmpi slt, %22, %176 : vector<1x512xi32>
    %cst_63 = arith.constant 0.000000e+00 : f32
    %178 = vector.shape_cast %177 : vector<1x512xi1> to vector<1x512xi1>
    %179 = vector.broadcast %178 : vector<1x512xi1> to vector<8x512xi1>
    %180 = vector.broadcast %cst_63 : f32 to vector<8x512xf32>
    %181 = arith.select %179, %175, %180 : vector<8x512xi1>, vector<8x512xf32>
    %c24_64 = arith.constant 24 : index
    %c0_65 = arith.constant 0 : index
    %182 = vector.load %arg7[%c24_64, %c0_65] : memref<128x512xf32, #tpu.memory_space<vmem>>, vector<8x512xf32>
    tpu.vector_store %arg7[%c24_64, %c0_65], %181 {strides = array<i32>} : memref<128x512xf32, #tpu.memory_space<vmem>>, vector<8x512xf32>,
    %c508_i32_66 = arith.constant 508 : i32
    %183 = tpu.dynamic_rotate %157 by %c508_i32_66 dim 1 : vector<8x512xf32>, i32 -> vector<8x512xf32>
    %c124_i32_67 = arith.constant 124 : i32
    %184 = vector.broadcast %c124_i32_67 : i32 to vector<1x512xi32>
    %185 = arith.cmpi slt, %22, %184 : vector<1x512xi32>
    %cst_68 = arith.constant 0.000000e+00 : f32
    %186 = vector.shape_cast %185 : vector<1x512xi1> to vector<1x512xi1>
    %187 = vector.broadcast %186 : vector<1x512xi1> to vector<8x512xi1>
    %188 = vector.broadcast %cst_68 : f32 to vector<8x512xf32>
    %189 = arith.select %187, %183, %188 : vector<8x512xi1>, vector<8x512xf32>
    %c32_69 = arith.constant 32 : index
    %c0_70 = arith.constant 0 : index
    %190 = vector.load %arg7[%c32_69, %c0_70] : memref<128x512xf32, #tpu.memory_space<vmem>>, vector<8x512xf32>
    tpu.vector_store %arg7[%c32_69, %c0_70], %189 {strides = array<i32>} : memref<128x512xf32, #tpu.memory_space<vmem>>, vector<8x512xf32>,
    %c507_i32_71 = arith.constant 507 : i32
    %191 = tpu.dynamic_rotate %157 by %c507_i32_71 dim 1 : vector<8x512xf32>, i32 -> vector<8x512xf32>
    %c123_i32_72 = arith.constant 123 : i32
    %192 = vector.broadcast %c123_i32_72 : i32 to vector<1x512xi32>
    %193 = arith.cmpi slt, %22, %192 : vector<1x512xi32>
    %cst_73 = arith.constant 0.000000e+00 : f32
    %194 = vector.shape_cast %193 : vector<1x512xi1> to vector<1x512xi1>
    %195 = vector.broadcast %194 : vector<1x512xi1> to vector<8x512xi1>
    %196 = vector.broadcast %cst_73 : f32 to vector<8x512xf32>
    %197 = arith.select %195, %191, %196 : vector<8x512xi1>, vector<8x512xf32>
    %c40_74 = arith.constant 40 : index
    %c0_75 = arith.constant 0 : index
    %198 = vector.load %arg7[%c40_74, %c0_75] : memref<128x512xf32, #tpu.memory_space<vmem>>, vector<8x512xf32>
    tpu.vector_store %arg7[%c40_74, %c0_75], %197 {strides = array<i32>} : memref<128x512xf32, #tpu.memory_space<vmem>>, vector<8x512xf32>,
    %c506_i32_76 = arith.constant 506 : i32
    %199 = tpu.dynamic_rotate %157 by %c506_i32_76 dim 1 : vector<8x512xf32>, i32 -> vector<8x512xf32>
    %c122_i32_77 = arith.constant 122 : i32
    %200 = vector.broadcast %c122_i32_77 : i32 to vector<1x512xi32>
    %201 = arith.cmpi slt, %22, %200 : vector<1x512xi32>
    %cst_78 = arith.constant 0.000000e+00 : f32
    %202 = vector.shape_cast %201 : vector<1x512xi1> to vector<1x512xi1>
    %203 = vector.broadcast %202 : vector<1x512xi1> to vector<8x512xi1>
    %204 = vector.broadcast %cst_78 : f32 to vector<8x512xf32>
    %205 = arith.select %203, %199, %204 : vector<8x512xi1>, vector<8x512xf32>
    %c48_79 = arith.constant 48 : index
    %c0_80 = arith.constant 0 : index
    %206 = vector.load %arg7[%c48_79, %c0_80] : memref<128x512xf32, #tpu.memory_space<vmem>>, vector<8x512xf32>
    tpu.vector_store %arg7[%c48_79, %c0_80], %205 {strides = array<i32>} : memref<128x512xf32, #tpu.memory_space<vmem>>, vector<8x512xf32>,
    %c505_i32_81 = arith.constant 505 : i32
    %207 = tpu.dynamic_rotate %157 by %c505_i32_81 dim 1 : vector<8x512xf32>, i32 -> vector<8x512xf32>
    %c121_i32_82 = arith.constant 121 : i32
    %208 = vector.broadcast %c121_i32_82 : i32 to vector<1x512xi32>
    %209 = arith.cmpi slt, %22, %208 : vector<1x512xi32>
    %cst_83 = arith.constant 0.000000e+00 : f32
    %210 = vector.shape_cast %209 : vector<1x512xi1> to vector<1x512xi1>
    %211 = vector.broadcast %210 : vector<1x512xi1> to vector<8x512xi1>
    %212 = vector.broadcast %cst_83 : f32 to vector<8x512xf32>
    %213 = arith.select %211, %207, %212 : vector<8x512xi1>, vector<8x512xf32>
    %c56_84 = arith.constant 56 : index
    %c0_85 = arith.constant 0 : index
    %214 = vector.load %arg7[%c56_84, %c0_85] : memref<128x512xf32, #tpu.memory_space<vmem>>, vector<8x512xf32>
    tpu.vector_store %arg7[%c56_84, %c0_85], %213 {strides = array<i32>} : memref<128x512xf32, #tpu.memory_space<vmem>>, vector<8x512xf32>,
    %c504_i32_86 = arith.constant 504 : i32
    %215 = tpu.dynamic_rotate %157 by %c504_i32_86 dim 1 : vector<8x512xf32>, i32 -> vector<8x512xf32>
    %c120_i32_87 = arith.constant 120 : i32
    %216 = vector.broadcast %c120_i32_87 : i32 to vector<1x512xi32>
    %217 = arith.cmpi slt, %22, %216 : vector<1x512xi32>
    %cst_88 = arith.constant 0.000000e+00 : f32
    %218 = vector.shape_cast %217 : vector<1x512xi1> to vector<1x512xi1>
    %219 = vector.broadcast %218 : vector<1x512xi1> to vector<8x512xi1>
    %220 = vector.broadcast %cst_88 : f32 to vector<8x512xf32>
    %221 = arith.select %219, %215, %220 : vector<8x512xi1>, vector<8x512xf32>
    %c64_89 = arith.constant 64 : index
    %c0_90 = arith.constant 0 : index
    %222 = vector.load %arg7[%c64_89, %c0_90] : memref<128x512xf32, #tpu.memory_space<vmem>>, vector<8x512xf32>
    tpu.vector_store %arg7[%c64_89, %c0_90], %221 {strides = array<i32>} : memref<128x512xf32, #tpu.memory_space<vmem>>, vector<8x512xf32>,
    %c503_i32_91 = arith.constant 503 : i32
    %223 = tpu.dynamic_rotate %157 by %c503_i32_91 dim 1 : vector<8x512xf32>, i32 -> vector<8x512xf32>
    %c119_i32_92 = arith.constant 119 : i32
    %224 = vector.broadcast %c119_i32_92 : i32 to vector<1x512xi32>
    %225 = arith.cmpi slt, %22, %224 : vector<1x512xi32>
    %cst_93 = arith.constant 0.000000e+00 : f32
    %226 = vector.shape_cast %225 : vector<1x512xi1> to vector<1x512xi1>
    %227 = vector.broadcast %226 : vector<1x512xi1> to vector<8x512xi1>
    %228 = vector.broadcast %cst_93 : f32 to vector<8x512xf32>
    %229 = arith.select %227, %223, %228 : vector<8x512xi1>, vector<8x512xf32>
    %c72_94 = arith.constant 72 : index
    %c0_95 = arith.constant 0 : index
    %230 = vector.load %arg7[%c72_94, %c0_95] : memref<128x512xf32, #tpu.memory_space<vmem>>, vector<8x512xf32>
    tpu.vector_store %arg7[%c72_94, %c0_95], %229 {strides = array<i32>} : memref<128x512xf32, #tpu.memory_space<vmem>>, vector<8x512xf32>,
    %c502_i32_96 = arith.constant 502 : i32
    %231 = tpu.dynamic_rotate %157 by %c502_i32_96 dim 1 : vector<8x512xf32>, i32 -> vector<8x512xf32>
    %c118_i32_97 = arith.constant 118 : i32
    %232 = vector.broadcast %c118_i32_97 : i32 to vector<1x512xi32>
    %233 = arith.cmpi slt, %22, %232 : vector<1x512xi32>
    %cst_98 = arith.constant 0.000000e+00 : f32
    %234 = vector.shape_cast %233 : vector<1x512xi1> to vector<1x512xi1>
    %235 = vector.broadcast %234 : vector<1x512xi1> to vector<8x512xi1>
    %236 = vector.broadcast %cst_98 : f32 to vector<8x512xf32>
    %237 = arith.select %235, %231, %236 : vector<8x512xi1>, vector<8x512xf32>
    %c80_99 = arith.constant 80 : index
    %c0_100 = arith.constant 0 : index
    %238 = vector.load %arg7[%c80_99, %c0_100] : memref<128x512xf32, #tpu.memory_space<vmem>>, vector<8x512xf32>
    tpu.vector_store %arg7[%c80_99, %c0_100], %237 {strides = array<i32>} : memref<128x512xf32, #tpu.memory_space<vmem>>, vector<8x512xf32>,
    %c501_i32_101 = arith.constant 501 : i32
    %239 = tpu.dynamic_rotate %157 by %c501_i32_101 dim 1 : vector<8x512xf32>, i32 -> vector<8x512xf32>
    %c117_i32_102 = arith.constant 117 : i32
    %240 = vector.broadcast %c117_i32_102 : i32 to vector<1x512xi32>
    %241 = arith.cmpi slt, %22, %240 : vector<1x512xi32>
    %cst_103 = arith.constant 0.000000e+00 : f32
    %242 = vector.shape_cast %241 : vector<1x512xi1> to vector<1x512xi1>
    %243 = vector.broadcast %242 : vector<1x512xi1> to vector<8x512xi1>
    %244 = vector.broadcast %cst_103 : f32 to vector<8x512xf32>
    %245 = arith.select %243, %239, %244 : vector<8x512xi1>, vector<8x512xf32>
    %c88_104 = arith.constant 88 : index
    %c0_105 = arith.constant 0 : index
    %246 = vector.load %arg7[%c88_104, %c0_105] : memref<128x512xf32, #tpu.memory_space<vmem>>, vector<8x512xf32>
    tpu.vector_store %arg7[%c88_104, %c0_105], %245 {strides = array<i32>} : memref<128x512xf32, #tpu.memory_space<vmem>>, vector<8x512xf32>,
    %c500_i32_106 = arith.constant 500 : i32
    %247 = tpu.dynamic_rotate %157 by %c500_i32_106 dim 1 : vector<8x512xf32>, i32 -> vector<8x512xf32>
    %c116_i32_107 = arith.constant 116 : i32
    %248 = vector.broadcast %c116_i32_107 : i32 to vector<1x512xi32>
    %249 = arith.cmpi slt, %22, %248 : vector<1x512xi32>
    %cst_108 = arith.constant 0.000000e+00 : f32
    %250 = vector.shape_cast %249 : vector<1x512xi1> to vector<1x512xi1>
    %251 = vector.broadcast %250 : vector<1x512xi1> to vector<8x512xi1>
    %252 = vector.broadcast %cst_108 : f32 to vector<8x512xf32>
    %253 = arith.select %251, %247, %252 : vector<8x512xi1>, vector<8x512xf32>
    %c96_109 = arith.constant 96 : index
    %c0_110 = arith.constant 0 : index
    %254 = vector.load %arg7[%c96_109, %c0_110] : memref<128x512xf32, #tpu.memory_space<vmem>>, vector<8x512xf32>
    tpu.vector_store %arg7[%c96_109, %c0_110], %253 {strides = array<i32>} : memref<128x512xf32, #tpu.memory_space<vmem>>, vector<8x512xf32>,
    %c499_i32_111 = arith.constant 499 : i32
    %255 = tpu.dynamic_rotate %157 by %c499_i32_111 dim 1 : vector<8x512xf32>, i32 -> vector<8x512xf32>
    %c115_i32_112 = arith.constant 115 : i32
    %256 = vector.broadcast %c115_i32_112 : i32 to vector<1x512xi32>
    %257 = arith.cmpi slt, %22, %256 : vector<1x512xi32>
    %cst_113 = arith.constant 0.000000e+00 : f32
    %258 = vector.shape_cast %257 : vector<1x512xi1> to vector<1x512xi1>
    %259 = vector.broadcast %258 : vector<1x512xi1> to vector<8x512xi1>
    %260 = vector.broadcast %cst_113 : f32 to vector<8x512xf32>
    %261 = arith.select %259, %255, %260 : vector<8x512xi1>, vector<8x512xf32>
    %c104_114 = arith.constant 104 : index
    %c0_115 = arith.constant 0 : index
    %262 = vector.load %arg7[%c104_114, %c0_115] : memref<128x512xf32, #tpu.memory_space<vmem>>, vector<8x512xf32>
    tpu.vector_store %arg7[%c104_114, %c0_115], %261 {strides = array<i32>} : memref<128x512xf32, #tpu.memory_space<vmem>>, vector<8x512xf32>,
    %c498_i32_116 = arith.constant 498 : i32
    %263 = tpu.dynamic_rotate %157 by %c498_i32_116 dim 1 : vector<8x512xf32>, i32 -> vector<8x512xf32>
    %c114_i32_117 = arith.constant 114 : i32
    %264 = vector.broadcast %c114_i32_117 : i32 to vector<1x512xi32>
    %265 = arith.cmpi slt, %22, %264 : vector<1x512xi32>
    %cst_118 = arith.constant 0.000000e+00 : f32
    %266 = vector.shape_cast %265 : vector<1x512xi1> to vector<1x512xi1>
    %267 = vector.broadcast %266 : vector<1x512xi1> to vector<8x512xi1>
    %268 = vector.broadcast %cst_118 : f32 to vector<8x512xf32>
    %269 = arith.select %267, %263, %268 : vector<8x512xi1>, vector<8x512xf32>
    %c112_119 = arith.constant 112 : index
    %c0_120 = arith.constant 0 : index
    %270 = vector.load %arg7[%c112_119, %c0_120] : memref<128x512xf32, #tpu.memory_space<vmem>>, vector<8x512xf32>
    tpu.vector_store %arg7[%c112_119, %c0_120], %269 {strides = array<i32>} : memref<128x512xf32, #tpu.memory_space<vmem>>, vector<8x512xf32>,
    %c497_i32_121 = arith.constant 497 : i32
    %271 = tpu.dynamic_rotate %157 by %c497_i32_121 dim 1 : vector<8x512xf32>, i32 -> vector<8x512xf32>
    %c113_i32_122 = arith.constant 113 : i32
    %272 = vector.broadcast %c113_i32_122 : i32 to vector<1x512xi32>
    %273 = arith.cmpi slt, %22, %272 : vector<1x512xi32>
    %cst_123 = arith.constant 0.000000e+00 : f32
    %274 = vector.shape_cast %273 : vector<1x512xi1> to vector<1x512xi1>
    %275 = vector.broadcast %274 : vector<1x512xi1> to vector<8x512xi1>
    %276 = vector.broadcast %cst_123 : f32 to vector<8x512xf32>
    %277 = arith.select %275, %271, %276 : vector<8x512xi1>, vector<8x512xf32>
    %c120_124 = arith.constant 120 : index
    %c0_125 = arith.constant 0 : index
    %278 = vector.load %arg7[%c120_124, %c0_125] : memref<128x512xf32, #tpu.memory_space<vmem>>, vector<8x512xf32>
    tpu.vector_store %arg7[%c120_124, %c0_125], %277 {strides = array<i32>} : memref<128x512xf32, #tpu.memory_space<vmem>>, vector<8x512xf32>,
    %c0_126 = arith.constant 0 : index
    %c0_127 = arith.constant 0 : index
    %279 = vector.load %arg3[%c0_126, %c0_127] : memref<8x128xf32, #tpu.memory_space<vmem>>, vector<8x128xf32>
    %c0_128 = arith.constant 0 : index
    %c0_129 = arith.constant 0 : index
    %280 = vector.load %arg7[%c0_128, %c0_129] : memref<128x512xf32, #tpu.memory_space<vmem>>, vector<128x512xf32>
    %cst_130 = arith.constant dense<0.000000e+00> : vector<8x512xf32>
    %281 = tpu.matmul %279, %280, %cst_130 {dimension_numbers = #tpu.dot_dimension_numbers<[1], [0], [0], [1], [0, 0, 1, 1], [], []>} : vector<8x128xf32>, vector<128x512xf32>, vector<8x512xf32> -> vector<8x512xf32>
    %c0_131 = arith.constant 0 : index
    %c0_132 = arith.constant 0 : index
    %282 = vector.load %arg1[%c0_131, %c0_132] : memref<8x512xf32, #tpu.memory_space<vmem>>, vector<8x512xf32>
    %283 = arith.addf %281, %282 : vector<8x512xf32>
    %c0_133 = arith.constant 0 : index
    %c0_134 = arith.constant 0 : index
    %284 = vector.load %arg5[%c0_133, %c0_134] : memref<8x512xf32, #tpu.memory_space<vmem>>, vector<8x512xf32>
    tpu.vector_store %arg5[%c0_133, %c0_134], %283 {strides = array<i32>} : memref<8x512xf32, #tpu.memory_space<vmem>>, vector<8x512xf32>,
    return
  }
  func.func @transform_0(%arg0: i32) -> (i32, i32) {
    %c0_i32 = arith.constant 0 : i32
    %c0_i32_0 = arith.constant 0 : i32
    return %c0_i32, %arg0 : i32, i32
  }
  func.func @transform_1(%arg0: i32) -> (i32, i32) {
    %c0_i32 = arith.constant 0 : i32
    %c0_i32_0 = arith.constant 0 : i32
    %c0_i32_1 = arith.constant 0 : i32
    return %c0_i32, %c0_i32_0 : i32, i32
  }
  func.func @transform_2(%arg0: i32) -> (i32, i32) {
    %c0_i32 = arith.constant 0 : i32
    %c0_i32_0 = arith.constant 0 : i32
    %c0_i32_1 = arith.constant 0 : i32
    return %c0_i32, %c0_i32_0 : i32, i32
  }
  func.func @transform_3(%arg0: i32) -> (i32, i32, i32) {
    %c0_i32 = arith.constant 0 : i32
    %c0_i32_0 = arith.constant 0 : i32
    %c0_i32_1 = arith.constant 0 : i32
    %c0_i32_2 = arith.constant 0 : i32
    return %c0_i32, %c0_i32_0, %c0_i32_1 : i32, i32, i32
  }
  func.func @transform_4(%arg0: i32) -> (i32, i32) {
    %c0_i32 = arith.constant 0 : i32
    %c0_i32_0 = arith.constant 0 : i32
    return %c0_i32, %arg0 : i32, i32
  }
}

</mosaic_0001>

<bundles_post_ra>
// kernel: tpu_custom_call.1
= control target key start
LH: loop header
LB: loop body
LE: loop exit
PB: predicated region body
PF: predicated region fallthrough
CT: control target
= control target key end

     0   :  { %9 = vsyncpa [#allocation5], 0  ;;  %s2907_s0 = inlined_call_operand.hbm [shape: f32[8,512], index: 0, kind: input, shape index: {}]   ;;  %s2908_s1 = inlined_call_operand.vmem [shape: f32[8,128], index: 1, kind: input, shape index: {}]   ;;  %s2909_s2 = inlined_call_operand.vmem [shape: f32[8,128], index: 2, kind: input, shape index: {}]   ;;  %s2910_s3 = inlined_call_operand.vmem [shape: f32[3,8,1], index: 3, kind: input, shape index: {}]   ;;  %s2911_s4 = inlined_call_operand.hbm [shape: f32[8,512], index: 4, kind: output, shape index: {}]  }
   0x1   :  { %10 = vsyncpa [#allocation6], 0  ;;  %s2046_s15 = smov [#allocation4]   ;;  %s1998_s19 = scalar_lea.hbm %s2907_s0, 512 }
   0x2   :  { %s17_s16 = sshll.u32 %s2046_s15, 4  ;;  %p1999_p0 = scmp.ne.s32.totalorder %s2907_s0, %s1998_s19  ;;  %s18_s16 = int_to_ptr.vmem [resolvable:$true] %s17_s16 }
   0x3   :  { %p2002_p1 = scmp.lt.u32.totalorder %s1998_s19, %s2907_s0 }
   0x5   :  { %p2004_p2 = pnand %p2002_p1, %p1999_p0 }
   0x7   :  { %2007 = shalt.err (!%p2004_p2)
}
   0x8   :  { %s2008_s24 = scalar_lea.vmem %s18_s16, 512  ;;  %p2013_p4 = scmp.lt.s32.totalorder %s18_s16, %s18_s16 }
   0x9   :  { %p2009_p3 = scmp.ne.s32.totalorder %s18_s16, %s2008_s24  ;;  %p2014_p5 = scmp.lt.s32.totalorder %s2008_s24, %s2008_s24 }
   0xb   :  { %p2015_p6 = por %p2014_p5, %p2013_p4 }
   0xd   :  { %p2016_p7 = pnand %p2015_p6, %p2009_p3 }
   0xf   :  { %2019 = shalt.err (!%p2016_p7)
}
  0x10   :  { %20 = dma.hbm_to_vmem [thread:$0]  %s2907_s0, 512, %s18_s16, [#allocation5]  }
  0x11   :  { %2042 = dma.done.wait [#allocation5], 512  }
  0x12   :  { %2043 = vsyncadd [#allocation5], 4294966784  ;;  %v2047_v0 = vmov 0   ;;  %v30_v1 = vld [vmem:[%s2910_s3] sm:$0xff]  ;;  %v1363_v2 = vld [vmem:[%s2910_s3 + $0x8] sm:$0xff]  ;;  %s2048_s0 = smov 126   ;;  %v35_v25 = vlaneseq }
  0x13   :  { %1697 = vset.pattern.permute.xlu0 %v2047_v0  ;;  %v88_v3 = vld [vmem:[#allocation4] sm:$0xff]  ;;  %v89_v4 = vld [vmem:[#allocation4 + $0x8] sm:$0xff]  ;;  %v90_v5 = vld [vmem:[#allocation4 + $0x10] sm:$0xff]  ;;  %s2049_s5 = smov 127   ;;  %s2050_s6 = smov 125   ;;  %v2063_v24 = vmov 0.0  }
  0x14   :  { %94 = vperm.xlu0 %1697, %v30_v1   ;;  %v91_v6 = vld [vmem:[#allocation4 + $0x18] sm:$0xff]  ;;  %s2051_s7 = smov 124   ;;  %s2052_s8 = smov 123   ;;  %v1364_v23 = vld [vmem:[%s2910_s3 + $0x10] sm:$0xff]  ;;  %747 = vmatprep.mubr.f32.mxu0 %v2063_v24  ;;  %v2164_v26 = vand.u32 127, %v35_v25  ;;  %vm2064_vm3 = vmmov 1  }
  0x15   :  { %s2053_s9 = smov 122   ;;  %s2054_s10 = smov 121   ;;  %818 = vmatprep.mubr.f32.mxu1 %v2063_v24 }
  0x16   :  { %s2055_s11 = smov 120   ;;  %s2056_s12 = smov 119   ;;  %v37_v27 = vadd.s32 128, %v2164_v26  ;;  %v39_v28 = vadd.s32 384, %v2164_v26  ;;  %v38_v29 = vadd.s32 256, %v2164_v26  ;;  %vm2914_vm0 = vcmp.lt.s32.totalorder %v2164_v26, 127 }
  0x17   :  { %s2057_s13 = smov 118   ;;  %s2058_s14 = smov 117   ;;  %vm2206_vm7 = vmpackc.low %vm2914_vm0, %vm2064_vm3  ;;  %vm2912_vm9 = vcmp.lt.s32.totalorder %v2164_v26, 125  ;;  %vm2913_vm14 = vcmp.lt.s32.totalorder %v2164_v26, 126 }
  0x18   :  { %103 = vperm.xlu0 %1697, %v1363_v2   ;;  %s2059_s15 = smov 116   ;;  %s2060_s16 = smov 115   ;;  %v2169_v30 = vand.u32 127, %v37_v27  ;;  %v2171_v33 = vand.u32 127, %v39_v28  ;;  %v2173_v36 = vand.u32 127, %v38_v29 }
  0x19   :  { %s2061_s17 = smov 114   ;;  %s2062_s18 = smov 113  }
  0x1a   :  { %vm132_vm1 = vcmp.lt.s32.totalorder %v2169_v30, 127  ;;  %vm134_vm2 = vcmp.lt.s32.totalorder %v2171_v33, 127  ;;  %vm133_vm5 = vcmp.lt.s32.totalorder %v2173_v36, 127  ;;  %vm165_vm10 = vcmp.lt.s32.totalorder %v2169_v30, 126  ;;  %s2065_s23 = smov [#allocation7]  }
  0x1b   :  { %vm2179_vm4 = vmpackc.low %vm132_vm1, %vm2064_vm3  ;;  %vm198_vm11 = vcmp.lt.s32.totalorder %v2169_v30, 125  ;;  %vm167_vm12 = vcmp.lt.s32.totalorder %v2171_v33, 126  ;;  %vm200_vm13 = vcmp.lt.s32.totalorder %v2171_v33, 125  ;;  %vm166_vm15 = vcmp.lt.s32.totalorder %v2173_v36, 126  ;;  %s1354_s24 = sshll.u32 %s2065_s23, 4  ;;  %s1355_s24 = int_to_ptr.vmem [resolvable:$true] %s1354_s24 }
  0x1c   :  { %vm2191_vm6 = vmpackc.low %vm134_vm2, %vm2064_vm3  ;;  %vm199_vm2 = vcmp.lt.s32.totalorder %v2173_v36, 125  ;;  %p2025_p9 = scmp.lt.s32.totalorder %s1355_s24, %s1355_s24 }
  0x1d   :  { %vm2215_vm8 = vmpackc.low %vm133_vm5, %vm2064_vm3 }
  0x1e   :  { %vm2244_vm1 = vmpackc.low %vm198_vm11, %vm165_vm10  ;;  %vm2915_vm11 = vcmp.lt.s32.totalorder %v2164_v26, 123 }
  0x1f   :  { %vm2259_vm3 = vmpackc.low %vm200_vm13, %vm167_vm12  ;;  %vm231_vm12 = vcmp.lt.s32.totalorder %v2169_v30, 124  ;;  %vm264_vm13 = vcmp.lt.s32.totalorder %v2169_v30, 123 }
  0x20   :  { %vm2271_vm5 = vmpackc.low %vm2912_vm9, %vm2913_vm14 }
  0x21   :  { %vm2277_vm10 = vmpackc.low %vm199_vm2, %vm166_vm15  ;;  %vm266_vm2 = vcmp.lt.s32.totalorder %v2171_v33, 123  ;;  %vm265_vm15 = vcmp.lt.s32.totalorder %v2173_v36, 123 }
  0x93   :  { %v95_v7 = vpop.permute.xlu0 %94 }
  0x94   :  { %v97_v8 = vmul.f32 %v95_v7, %v88_v3  ;;  %v98_v9 = vmul.f32 %v95_v7, %v89_v4  ;;  %v99_v10 = vmul.f32 %v95_v7, %v90_v5  ;;  %v100_v11 = vmul.f32 %v95_v7, %v91_v6 }
  0x95   :  { %v2955_v4 = vmov 0 }
  0x96   :  { %v2956_v4 = vsel %vm2244_vm1, 4294967295, %v2955_v4 }
  0x97   :  { %v104_v12 = vpop.permute.xlu0 %103 }
  0x98   :  { %v2109_v13 = vadd.f32 %v104_v12, %v97_v8  ;;  %v2111_v14 = vadd.f32 %v104_v12, %v98_v9  ;;  %v2113_v15 = vadd.f32 %v104_v12, %v99_v10  ;;  %v2115_v16 = vadd.f32 %v104_v12, %v100_v11 }
  0x99   :  { %v2957_v9 = vmov 0 }
  0x9a   :  { %v110_v17 = vmax.f32 %v2109_v13, 0.0  ;;  %v111_v18 = vmax.f32 %v2111_v14, 0.0  ;;  %v112_v19 = vmax.f32 %v2113_v15, 0.0  ;;  %v113_v20 = vmax.f32 %v2115_v16, 0.0 }
  0x9b   :  { %v2958_v9 = vsel %vm2259_vm3, 4294967295, %v2957_v9  ;;  %v2959_v16 = vmov 0 }
  0x9c   :  { %v1708_v21 = vpack.i.bf16 %v111_v18, %v110_v17  ;;  %v1703_v22 = vpack.i.bf16 %v113_v20, %v112_v19  ;;  %v2960_v16 = vsel %vm2271_vm5, 4294967295, %v2959_v16 }
  0x9e   :  { %1709 = vrot.lane.b32.xlu0 %v1708_v21, %s2048_s0  ;;  %1699 = vrot.lane.b32.xlu1 %v1708_v21, %s2049_s5 }
  0xa2   :  { %1719 = vrot.lane.b32.xlu0 %v1708_v21, %s2050_s6  ;;  %1704 = vrot.lane.b32.xlu1 %v1703_v22, %s2049_s5 }
  0xa6   :  { %1729 = vrot.lane.b32.xlu0 %v1708_v21, %s2051_s7  ;;  %1714 = vrot.lane.b32.xlu1 %v1703_v22, %s2048_s0 }
  0xaa   :  { %1739 = vrot.lane.b32.xlu0 %v1708_v21, %s2052_s8  ;;  %1724 = vrot.lane.b32.xlu1 %v1703_v22, %s2050_s6 }
  0xae   :  { %1749 = vrot.lane.b32.xlu0 %v1708_v21, %s2053_s9  ;;  %1734 = vrot.lane.b32.xlu1 %v1703_v22, %s2051_s7 }
  0xb2   :  { %1759 = vrot.lane.b32.xlu0 %v1708_v21, %s2054_s10  ;;  %1744 = vrot.lane.b32.xlu1 %v1703_v22, %s2052_s8 }
  0xb6   :  { %1769 = vrot.lane.b32.xlu0 %v1708_v21, %s2055_s11  ;;  %1754 = vrot.lane.b32.xlu1 %v1703_v22, %s2053_s9 }
  0xba   :  { %1779 = vrot.lane.b32.xlu0 %v1708_v21, %s2056_s12  ;;  %1764 = vrot.lane.b32.xlu1 %v1703_v22, %s2054_s10 }
  0xbe   :  { %1789 = vrot.lane.b32.xlu0 %v1708_v21, %s2057_s13  ;;  %1774 = vrot.lane.b32.xlu1 %v1703_v22, %s2055_s11 }
  0xc2   :  { %1799 = vrot.lane.b32.xlu0 %v1708_v21, %s2058_s14  ;;  %1784 = vrot.lane.b32.xlu1 %v1703_v22, %s2056_s12 }
  0xc6   :  { %1809 = vrot.lane.b32.xlu0 %v1708_v21, %s2059_s15  ;;  %1794 = vrot.lane.b32.xlu1 %v1703_v22, %s2057_s13 }
  0xca   :  { %1819 = vrot.lane.b32.xlu0 %v1708_v21, %s2060_s16  ;;  %1804 = vrot.lane.b32.xlu1 %v1703_v22, %s2058_s14 }
  0xce   :  { %1829 = vrot.lane.b32.xlu0 %v1708_v21, %s2061_s17  ;;  %1814 = vrot.lane.b32.xlu1 %v1703_v22, %s2059_s15 }
  0xd2   :  { %1839 = vrot.lane.b32.xlu0 %v1708_v21, %s2062_s18  ;;  %1824 = vrot.lane.b32.xlu1 %v1703_v22, %s2060_s16 }
  0xd6   :  { %680 = vperm.xlu0 %1697, %v1364_v23   ;;  %1834 = vrot.lane.b32.xlu1 %v1703_v22, %s2061_s17 }
  0xda   :  { %1844 = vrot.lane.b32.xlu1 %v1703_v22, %s2062_s18 }
 0x110   :  { %v1710_v31 = vpop.permute.xlu0 %1709  ;;  %v1700_v32 = vpop.permute.xlu1 %1699 }
 0x111   :  { %v1702_v34 = vunpack.i.h.bf16 %v1700_v32  ;;  %v1701_v35 = vunpack.i.l.bf16 %v1700_v32  ;;  %v1712_v59 = vunpack.i.h.bf16 %v1710_v31  ;;  %v1711_v60 = vunpack.i.l.bf16 %v1710_v31 }
 0x113   :  { %v129_v42 = vsel %vm2914_vm0, %v1701_v35, %v1702_v34  ;;  %v162_v10 = vsel %vm2913_vm14, %v1711_v60, %v1712_v59 }
 0x114   :  { %v1720_v37 = vpop.permute.xlu0 %1719  ;;  %v1705_v38 = vpop.permute.xlu1 %1704  ;;  %v1488_v53 = vpack.c.bf16 %v129_v42, %v110_v17 }
 0x115   :  { %v1707_v39 = vunpack.i.h.bf16 %v1705_v38  ;;  %v1706_v40 = vunpack.i.l.bf16 %v1705_v38  ;;  %v1722_v55 = vunpack.i.h.bf16 %v1720_v37  ;;  %v1721_v56 = vunpack.i.l.bf16 %v1720_v37 }
 0x116   :  { %v2963_v37 = vmov 0 }
 0x117   :  { %v128_v43 = vsel %vm2914_vm0, %v1702_v34, %v1706_v40  ;;  %v130_v44 = vsel %vm2914_vm0, %v1707_v39, %v1701_v35  ;;  %v127_v46 = vsel %vm2914_vm0, %v1706_v40, %v1707_v39  ;;  %v195_v1 = vsel %vm2912_vm9, %v1721_v56, %v1722_v55  ;;  %vm2308_vm0 = vmpackc.low %vm264_vm13, %vm231_vm12 }
 0x118   :  { %v2197_v47 = vpop.permute.xlu0 %1729  ;;  %v1715_v48 = vpop.permute.xlu1 %1714  ;;  %v1485_v49 = vpack.c.bf16 %v128_v43, %v111_v18  ;;  %v1533_v50 = vpack.c.bf16 %v130_v44, %v113_v20  ;;  %v1536_v52 = vpack.c.bf16 %v127_v46, %v112_v19  ;;  %v1494_v17 = vpack.c.bf16 %v195_v1, %v162_v10 }
 0x119   :  { %v1717_v57 = vunpack.i.h.bf16 %v1715_v48  ;;  %v1716_v58 = vunpack.i.l.bf16 %v1715_v48  ;;  %v2961_v18 = vmov 0  ;;  %v1732_v23 = vunpack.i.h.bf16 %v2197_v47 }
 0x11a   :  { %1487 = vmatprep.subr.msk.bf16.mxu0 %vm2179_vm4, %v1485_v49  ;;  %1535 = vmatprep.subr.msk.bf16.mxu1 %vm2191_vm6, %v1533_v50  ;;  %v2962_v18 = vsel %vm2277_vm10, 4294967295, %v2961_v18  ;;  %v1731_v25 = vunpack.i.l.bf16 %v2197_v47  ;;  %v2964_v37 = vsel %vm2308_vm0, 4294967295, %v2963_v37  ;;  %v2966_v43 = vmov 0 }
 0x11b   :  { %1490 = vmatpush1.bf16.msk.msra.mxu0 %vm2206_vm7, %v1488_v53  ;;  %1538 = vmatpush1.bf16.msk.msra.mxu1 %vm2215_vm8, %v1536_v52  ;;  %v163_v2 = vsel %vm2913_vm14, %v1717_v57, %v1711_v60  ;;  %v160_v3 = vsel %vm2913_vm14, %v1716_v58, %v1717_v57  ;;  %v161_v5 = vsel %vm2913_vm14, %v1712_v59, %v1716_v58  ;;  %vm2965_vm14 = vcmp.lt.s32.totalorder %v2171_v33, 124 }
 0x11c   :  { %v1740_v61 = vpop.permute.xlu0 %1739  ;;  %v1725_v62 = vpop.permute.xlu1 %1724  ;;  %vm2323_vm12 = vmpackc.low %vm266_vm2, %vm2965_vm14  ;;  %v2968_v52 = vmov 0  ;;  %vm2970_vm14 = vcmp.lt.s32.totalorder %v2173_v36, 124 }
 0x11d   :  { %v1727_v63 = vunpack.i.h.bf16 %v1725_v62  ;;  %v1726_v0 = vunpack.i.l.bf16 %v1725_v62  ;;  %v1742_v19 = vunpack.i.h.bf16 %v1740_v61  ;;  %v1741_v20 = vunpack.i.l.bf16 %v1740_v61  ;;  %vm2341_vm2 = vmpackc.low %vm265_vm15, %vm2970_vm14 }
 0x11e   :  { %v2967_v43 = vsel %vm2323_vm12, 4294967295, %v2966_v43  ;;  %vm2973_vm14 = vcmp.lt.s32.totalorder %v2164_v26, 121 }
 0x11f   :  { %v196_v6 = vsel %vm2912_vm9, %v1727_v63, %v1721_v56  ;;  %v193_v7 = vsel %vm2912_vm9, %v1726_v0, %v1727_v63  ;;  %v194_v8 = vsel %vm2912_vm9, %v1722_v55, %v1726_v0  ;;  %vm2916_vm9 = vcmp.lt.s32.totalorder %v2164_v26, 124  ;;  %vm2978_vm15 = vmmov %vm2973_vm14 }
 0x120   :  { %v1491_v11 = vpack.c.bf16 %v194_v8, %v161_v5  ;;  %v1539_v12 = vpack.c.bf16 %v196_v6, %v163_v2  ;;  %v1542_v13 = vpack.c.bf16 %v193_v7, %v160_v3  ;;  %v2265_v14 = vpop.permute.xlu0 %1749  ;;  %v1735_v15 = vpop.permute.xlu1 %1734  ;;  %v261_v32 = vsel %vm2915_vm11, %v1741_v20, %v1742_v19  ;;  %vm2335_vm13 = vmpackc.low %vm2915_vm11, %vm2916_vm9 }
 0x121   :  { %v1737_v21 = vunpack.i.h.bf16 %v1735_v15  ;;  %v1736_v22 = vunpack.i.l.bf16 %v1735_v15  ;;  %v228_v44 = vsel %vm2916_vm9, %v1731_v25, %v1732_v23  ;;  %v2969_v52 = vsel %vm2335_vm13, 4294967295, %v2968_v52 }
 0x122   :  { %1493 = vmatprep.subr.msk.bf16.mxu0 %vm2244_vm1, %v1491_v11  ;;  %1541 = vmatprep.subr.msk.bf16.mxu1 %vm2259_vm3, %v1539_v12  ;;  %v1500_v53 = vpack.c.bf16 %v261_v32, %v228_v44  ;;  %v2971_v55 = vmov 0  ;;  %v1752_v60 = vunpack.i.h.bf16 %v2265_v14  ;;  %v1751_v61 = vunpack.i.l.bf16 %v2265_v14 }
 0x123   :  { %1496 = vmatpush1.bf16.msk.msra.mxu0 %vm2271_vm5, %v1494_v17  ;;  %1544 = vmatpush1.bf16.msk.msra.mxu1 %vm2277_vm10, %v1542_v13  ;;  %v229_v34 = vsel %vm2916_vm9, %v1737_v21, %v1731_v25  ;;  %v226_v35 = vsel %vm2916_vm9, %v1736_v22, %v1737_v21  ;;  %v227_v38 = vsel %vm2916_vm9, %v1732_v23, %v1736_v22  ;;  %v2972_v55 = vsel %vm2341_vm2, 4294967295, %v2971_v55  ;;  %vm2979_vm10 = vmmov %vm2973_vm14 }
 0x124   :  { %v1760_v27 = vpop.permute.xlu0 %1759  ;;  %v1745_v28 = vpop.permute.xlu1 %1744  ;;  %vm2975_vm9 = vcmp.lt.s32.totalorder %v2169_v30, 121  ;;  %v2976_v6 = vmov 0  ;;  %vm2980_vm5 = vcmp.lt.s32.totalorder %v2171_v33, 122  ;;  %v2981_v12 = vmov 0 }
 0x125   :  { %v1747_v29 = vunpack.i.h.bf16 %v1745_v28  ;;  %v1746_v31 = vunpack.i.l.bf16 %v1745_v28  ;;  %v1762_v56 = vunpack.i.h.bf16 %v1760_v27  ;;  %v1761_v57 = vunpack.i.l.bf16 %v1760_v27 }
 0x126   :  { %v2984_v21 = vmov 0  ;;  %v2987_v23 = vmov 0 }
 0x127   :  { %v262_v39 = vsel %vm2915_vm11, %v1747_v29, %v1741_v20  ;;  %v259_v40 = vsel %vm2915_vm11, %v1746_v31, %v1747_v29  ;;  %v260_v42 = vsel %vm2915_vm11, %v1742_v19, %v1746_v31  ;;  %vm332_vm11 = vcmp.lt.s32.totalorder %v2171_v33, 121 }
 0x128   :  { %v1497_v46 = vpack.c.bf16 %v260_v42, %v227_v38  ;;  %v1545_v47 = vpack.c.bf16 %v262_v39, %v229_v34  ;;  %v1548_v48 = vpack.c.bf16 %v259_v40, %v226_v35  ;;  %v2329_v49 = vpop.permute.xlu0 %1769  ;;  %v1755_v50 = vpop.permute.xlu1 %1754  ;;  %v327_v2 = vsel %vm2973_vm14, %v1761_v57, %v1762_v56 }
 0x129   :  { %v1757_v58 = vunpack.i.h.bf16 %v1755_v50  ;;  %v1756_v59 = vunpack.i.l.bf16 %v1755_v50  ;;  %v1772_v31 = vunpack.i.h.bf16 %v2329_v49  ;;  %v1771_v32 = vunpack.i.l.bf16 %v2329_v49 }
 0x12a   :  { %1499 = vmatprep.subr.msk.bf16.mxu0 %vm2308_vm0, %v1497_v46  ;;  %1547 = vmatprep.subr.msk.bf16.mxu1 %vm2323_vm12, %v1545_v47  ;;  %vm2923_vm12 = vcmp.lt.s32.totalorder %v2164_v26, 122  ;;  %vm331_vm0 = vcmp.lt.s32.totalorder %v2173_v36, 121  ;;  %v2991_v46 = vmov 0 }
 0x12b   :  { %1502 = vmatpush1.bf16.msk.msra.mxu0 %vm2335_vm13, %v1500_v53  ;;  %1550 = vmatpush1.bf16.msk.msra.mxu1 %vm2341_vm2, %v1548_v48  ;;  %v295_v3 = vsel %vm2923_vm12, %v1757_v58, %v1751_v61  ;;  %v292_v5 = vsel %vm2923_vm12, %v1756_v59, %v1757_v58  ;;  %vm2974_vm2 = vcmp.lt.s32.totalorder %v2169_v30, 122  ;;  %v293_v7 = vsel %vm2923_vm12, %v1752_v60, %v1756_v59 }
 0x12c   :  { %v1780_v62 = vpop.permute.xlu0 %1779  ;;  %v1765_v63 = vpop.permute.xlu1 %1764  ;;  %vm2372_vm13 = vmpackc.low %vm2975_vm9, %vm2974_vm2  ;;  %v294_v13 = vsel %vm2923_vm12, %v1751_v61, %v1752_v60  ;;  %v2994_v53 = vmov 0 }
 0x12d   :  { %v1767_v0 = vunpack.i.h.bf16 %v1765_v63  ;;  %v1766_v1 = vunpack.i.l.bf16 %v1765_v63  ;;  %v2977_v6 = vsel %vm2372_vm13, 4294967295, %v2976_v6  ;;  %vm2387_vm9 = vmpackc.low %vm332_vm11, %vm2980_vm5  ;;  %v1506_v22 = vpack.c.bf16 %v327_v2, %v294_v13 }
 0x12e   :  { %v2982_v12 = vsel %vm2387_vm9, 4294967295, %v2981_v12  ;;  %vm2983_vm2 = vmmov %vm2979_vm10  ;;  %vm2986_vm5 = vcmp.lt.s32.totalorder %v2173_v36, 122  ;;  %v1782_v25 = vunpack.i.h.bf16 %v1780_v62  ;;  %v1781_v27 = vunpack.i.l.bf16 %v1780_v62 }
 0x12f   :  { %v328_v8 = vsel %vm2973_vm14, %v1767_v0, %v1761_v57  ;;  %v325_v10 = vsel %vm2978_vm15, %v1766_v1, %v1767_v0  ;;  %v326_v11 = vsel %vm2979_vm10, %v1762_v56, %v1766_v1  ;;  %vm2399_vm10 = vmpackc.low %vm2983_vm2, %vm2923_vm12  ;;  %vm2926_vm15 = vcmp.lt.s32.totalorder %v2164_v26, 119 }
 0x130   :  { %v1503_v14 = vpack.c.bf16 %v326_v11, %v293_v7  ;;  %v1551_v15 = vpack.c.bf16 %v328_v8, %v295_v3  ;;  %v1554_v17 = vpack.c.bf16 %v325_v10, %v292_v5  ;;  %v2393_v19 = vpop.permute.xlu0 %1789  ;;  %v1775_v20 = vpop.permute.xlu1 %1774  ;;  %v2985_v21 = vsel %vm2399_vm10, 4294967295, %v2984_v21  ;;  %vm2405_vm11 = vmpackc.low %vm331_vm0, %vm2986_vm5 }
 0x131   :  { %v2988_v23 = vsel %vm2405_vm11, 4294967295, %v2987_v23  ;;  %v1777_v28 = vunpack.i.h.bf16 %v1775_v20  ;;  %v1776_v29 = vunpack.i.l.bf16 %v1775_v20  ;;  %vm398_vm5 = vcmp.lt.s32.totalorder %v2171_v33, 119 }
 0x132   :  { %1505 = vmatprep.subr.msk.bf16.mxu0 %vm2372_vm13, %v1503_v14  ;;  %1553 = vmatprep.subr.msk.bf16.mxu1 %vm2387_vm9, %v1551_v15  ;;  %vm2927_vm12 = vcmp.lt.s32.totalorder %v2164_v26, 120  ;;  %v393_v40 = vsel %vm2926_vm15, %v1781_v27, %v1782_v25  ;;  %vm2989_vm14 = vcmp.lt.s32.totalorder %v2169_v30, 120  ;;  %vm2990_vm2 = vcmp.lt.s32.totalorder %v2169_v30, 119 }
 0x133   :  { %1508 = vmatpush1.bf16.msk.msra.mxu0 %vm2399_vm10, %v1506_v22  ;;  %1556 = vmatpush1.bf16.msk.msra.mxu1 %vm2405_vm11, %v1554_v17  ;;  %v361_v42 = vsel %vm2927_vm12, %v1777_v28, %v1771_v32  ;;  %v358_v44 = vsel %vm2927_vm12, %v1776_v29, %v1777_v28  ;;  %vm2436_vm11 = vmpackc.low %vm2990_vm2, %vm2989_vm14  ;;  %vm397_vm10 = vcmp.lt.s32.totalorder %v2173_v36, 119  ;;  %v359_v47 = vsel %vm2927_vm12, %v1772_v31, %v1776_v29 }
 0x134   :  { %v1800_v34 = vpop.permute.xlu0 %1799  ;;  %v1785_v35 = vpop.permute.xlu1 %1784  ;;  %v2992_v46 = vsel %vm2436_vm11, 4294967295, %v2991_v46  ;;  %vm2993_vm0 = vcmp.lt.s32.totalorder %v2171_v33, 120  ;;  %v360_v56 = vsel %vm2927_vm12, %v1771_v32, %v1772_v31  ;;  %vm2463_vm2 = vmpackc.low %vm2926_vm15, %vm2927_vm12  ;;  %v2996_v62 = vmov 0 }
 0x135   :  { %v1787_v38 = vunpack.i.h.bf16 %v1785_v35  ;;  %v1786_v39 = vunpack.i.l.bf16 %v1785_v35  ;;  %vm2451_vm14 = vmpackc.low %vm398_vm5, %vm2993_vm0  ;;  %v2997_v62 = vsel %vm2463_vm2, 4294967295, %v2996_v62  ;;  %v1512_v63 = vpack.c.bf16 %v393_v40, %v360_v56 }
 0x136   :  { %v2995_v53 = vsel %vm2451_vm14, 4294967295, %v2994_v53  ;;  %vm2998_vm0 = vcmp.lt.s32.totalorder %v2173_v36, 120  ;;  %v2999_v0 = vmov 0  ;;  %v1802_v1 = vunpack.i.h.bf16 %v1800_v34 }
 0x137   :  { %v394_v48 = vsel %vm2926_vm15, %v1787_v38, %v1781_v27  ;;  %v391_v49 = vsel %vm2926_vm15, %v1786_v39, %v1787_v38  ;;  %v392_v50 = vsel %vm2926_vm15, %v1782_v25, %v1786_v39  ;;  %vm2469_vm5 = vmpackc.low %vm397_vm10, %vm2998_vm0  ;;  %v1801_v2 = vunpack.i.l.bf16 %v1800_v34 }
 0x138   :  { %v1509_v57 = vpack.c.bf16 %v392_v50, %v359_v47  ;;  %v1557_v58 = vpack.c.bf16 %v394_v48, %v361_v42  ;;  %v1560_v59 = vpack.c.bf16 %v391_v49, %v358_v44  ;;  %v2457_v60 = vpop.permute.xlu0 %1809  ;;  %v1795_v61 = vpop.permute.xlu1 %1794  ;;  %v3000_v0 = vsel %vm2469_vm5, 4294967295, %v2999_v0 }
 0x139   :  { %v1797_v3 = vunpack.i.h.bf16 %v1795_v61  ;;  %v1796_v5 = vunpack.i.l.bf16 %v1795_v61  ;;  %v1792_v7 = vunpack.i.h.bf16 %v2393_v19  ;;  %v1791_v8 = vunpack.i.l.bf16 %v2393_v19 }
 0x13a   :  { %1511 = vmatprep.subr.msk.bf16.mxu0 %vm2436_vm11, %v1509_v57  ;;  %1559 = vmatprep.subr.msk.bf16.mxu1 %vm2451_vm14, %v1557_v58  ;;  %vm464_vm15 = vcmp.lt.s32.totalorder %v2171_v33, 117  ;;  %vm2934_vm14 = vcmp.lt.s32.totalorder %v2164_v26, 118  ;;  %vm3001_vm0 = vcmp.lt.s32.totalorder %v2164_v26, 117  ;;  %vm3003_vm12 = vcmp.lt.s32.totalorder %v2169_v30, 117 }
 0x13b   :  { %1514 = vmatpush1.bf16.msk.msra.mxu0 %vm2463_vm2, %v1512_v63  ;;  %1562 = vmatpush1.bf16.msk.msra.mxu1 %vm2469_vm5, %v1560_v59  ;;  %v459_v15 = vsel %vm3001_vm0, %v1801_v2, %v1802_v1  ;;  %v427_v17 = vsel %vm2934_vm14, %v1797_v3, %v1791_v8  ;;  %v424_v19 = vsel %vm2934_vm14, %v1796_v5, %v1797_v3  ;;  %vm3002_vm5 = vcmp.lt.s32.totalorder %v2169_v30, 118  ;;  %vm3006_vm10 = vmmov %vm3001_vm0 }
 0x13c   :  { %v1820_v10 = vpop.permute.xlu0 %1819  ;;  %v1805_v11 = vpop.permute.xlu1 %1804  ;;  %vm2500_vm2 = vmpackc.low %vm3003_vm12, %vm3002_vm5  ;;  %v3004_v20 = vmov 0  ;;  %vm463_vm11 = vcmp.lt.s32.totalorder %v2173_v36, 117  ;;  %v425_v22 = vsel %vm2934_vm14, %v1792_v7, %v1796_v5  ;;  %vm3008_vm13 = vcmp.lt.s32.totalorder %v2171_v33, 118 }
 0x13d   :  { %v1807_v13 = vunpack.i.h.bf16 %v1805_v11  ;;  %v1806_v14 = vunpack.i.l.bf16 %v1805_v11  ;;  %v3005_v20 = vsel %vm2500_vm2, 4294967295, %v3004_v20  ;;  %vm3007_vm9 = vmmov %vm3001_vm0  ;;  %v3009_v29 = vmov 0 }
 0x13e   :  { %vm2515_vm12 = vmpackc.low %vm464_vm15, %vm3008_vm13  ;;  %v426_v31 = vsel %vm2934_vm14, %v1791_v8, %v1792_v7  ;;  %v3012_v39 = vmov 0  ;;  %vm3014_vm13 = vcmp.lt.s32.totalorder %v2173_v36, 118  ;;  %v3015_v44 = vmov 0 }
 0x13f   :  { %v460_v25 = vsel %vm3001_vm0, %v1807_v13, %v1801_v2  ;;  %v457_v27 = vsel %vm3006_vm10, %v1806_v14, %v1807_v13  ;;  %v458_v28 = vsel %vm3007_vm9, %v1802_v1, %v1806_v14  ;;  %v3010_v29 = vsel %vm2515_vm12, 4294967295, %v3009_v29  ;;  %vm3011_vm5 = vmmov %vm3001_vm0 }
 0x140   :  { %v1515_v32 = vpack.c.bf16 %v458_v28, %v425_v22  ;;  %v1563_v34 = vpack.c.bf16 %v460_v25, %v427_v17  ;;  %v1566_v35 = vpack.c.bf16 %v457_v27, %v424_v19  ;;  %v1815_v38 = vpop.permute.xlu1 %1814  ;;  %vm2525_vm10 = vmpackc.low %vm3011_vm5, %vm2934_vm14  ;;  %v1518_v40 = vpack.c.bf16 %v459_v15, %v426_v31  ;;  %v2529_v42 = vpop.permute.xlu0 %1829 }
 0x141   :  { %v3013_v39 = vsel %vm2525_vm10, 4294967295, %v3012_v39  ;;  %vm2533_vm9 = vmpackc.low %vm463_vm11, %vm3014_vm13  ;;  %v1822_v47 = vunpack.i.h.bf16 %v1820_v10  ;;  %v1821_v48 = vunpack.i.l.bf16 %v1820_v10  ;;  %v1817_v49 = vunpack.i.h.bf16 %v1815_v38 }
 0x142   :  { %v3016_v44 = vsel %vm2533_vm9, 4294967295, %v3015_v44  ;;  %v1816_v50 = vunpack.i.l.bf16 %v1815_v38  ;;  %1517 = vmatprep.subr.msk.bf16.mxu0 %vm2500_vm2, %v1515_v32  ;;  %1565 = vmatprep.subr.msk.bf16.mxu1 %vm2515_vm12, %v1563_v34  ;;  %vm2939_vm15 = vcmp.lt.s32.totalorder %v2164_v26, 116  ;;  %vm2938_vm0 = vcmp.lt.s32.totalorder %v2164_v26, 115 }
 0x143   :  { %1520 = vmatpush1.bf16.msk.msra.mxu0 %vm2525_vm10, %v1518_v40  ;;  %v1812_v56 = vunpack.i.h.bf16 %v2457_v60  ;;  %v1811_v57 = vunpack.i.l.bf16 %v2457_v60  ;;  %1568 = vmatpush1.bf16.msk.msra.mxu1 %vm2533_vm9, %v1566_v35  ;;  %vm2557_vm11 = vmpackc.low %vm2938_vm0, %vm2939_vm15  ;;  %v3017_v63 = vmov 0  ;;  %vm496_vm5 = vcmp.lt.s32.totalorder %v2173_v36, 116 }
 0x144   :  { %v1825_v58 = vpop.permute.xlu1 %1824  ;;  %v3018_v63 = vsel %vm2557_vm11, 4294967295, %v3017_v63  ;;  %v525_v60 = vsel %vm2938_vm0, %v1821_v48, %v1822_v47  ;;  %v490_v2 = vsel %vm2939_vm15, %v1816_v50, %v1817_v49  ;;  %vm3019_vm14 = vcmp.lt.s32.totalorder %v2169_v30, 116  ;;  %v1840_v7 = vpop.permute.xlu0 %1839 }
 0x145   :  { %v1827_v59 = vunpack.i.h.bf16 %v1825_v58  ;;  %v1826_v61 = vunpack.i.l.bf16 %v1825_v58  ;;  %v493_v1 = vsel %vm2939_vm15, %v1817_v49, %v1811_v57  ;;  %vm3020_vm13 = vcmp.lt.s32.totalorder %v2169_v30, 115  ;;  %v1201_v49 = vld [vmem:[#allocation4 + $0x18] sm:$0xff] }
 0x146   :  { %vm2573_vm9 = vmpackc.low %vm3020_vm13, %vm3019_vm14  ;;  %v3021_v3 = vmov 0  ;;  %v491_v5 = vsel %vm2939_vm15, %v1812_v56, %v1816_v50  ;;  %vm3023_vm10 = vcmp.lt.s32.totalorder %v2171_v33, 116  ;;  %vm3024_vm14 = vcmp.lt.s32.totalorder %v2171_v33, 115 }
 0x147   :  { %v3022_v3 = vsel %vm2573_vm9, 4294967295, %v3021_v3  ;;  %v526_v8 = vsel %vm2938_vm0, %v1827_v59, %v1821_v48  ;;  %v523_v10 = vsel %vm2938_vm0, %v1826_v61, %v1827_v59  ;;  %v524_v11 = vsel %vm2938_vm0, %v1822_v47, %v1826_v61  ;;  %vm2589_vm13 = vmpackc.low %vm3024_vm14, %vm3023_vm10 }
 0x148   :  { %v3025_v13 = vmov 0  ;;  %v492_v14 = vsel %vm2939_vm15, %v1811_v57, %v1812_v56  ;;  %v1521_v15 = vpack.c.bf16 %v524_v11, %v491_v5  ;;  %v1569_v17 = vpack.c.bf16 %v526_v8, %v493_v1  ;;  %v1835_v22 = vpop.permute.xlu1 %1834 }
 0x149   :  { %v3026_v13 = vsel %vm2589_vm13, 4294967295, %v3025_v13  ;;  %v1572_v19 = vpack.c.bf16 %v523_v10, %v490_v2  ;;  %vm3027_vm12 = vcmp.lt.s32.totalorder %v2173_v36, 115  ;;  %v3028_v25 = vmov 0 }
 0x14a   :  { %vm2599_vm0 = vmpackc.low %vm3027_vm12, %vm496_vm5  ;;  %v1524_v27 = vpack.c.bf16 %v525_v60, %v492_v14  ;;  %vm561_vm10 = vcmp.lt.s32.totalorder %v2169_v30, 114  ;;  %v1842_v28 = vunpack.i.h.bf16 %v1840_v7  ;;  %v1841_v31 = vunpack.i.l.bf16 %v1840_v7  ;;  %1523 = vmatprep.subr.msk.bf16.mxu0 %vm2573_vm9, %v1521_v15  ;;  %1571 = vmatprep.subr.msk.bf16.mxu1 %vm2589_vm13, %v1569_v17 }
 0x14b   :  { %v3029_v25 = vsel %vm2599_vm0, 4294967295, %v3028_v25  ;;  %v1837_v32 = vunpack.i.h.bf16 %v1835_v22  ;;  %v1836_v34 = vunpack.i.l.bf16 %v1835_v22  ;;  %1574 = vmatpush1.bf16.msk.msra.mxu1 %vm2599_vm0, %v1572_v19  ;;  %v1832_v35 = vunpack.i.h.bf16 %v2529_v42 }
 0x14c   :  { %1526 = vmatpush1.bf16.msk.msra.mxu0 %vm2557_vm11, %v1524_v27  ;;  %v1831_v38 = vunpack.i.l.bf16 %v2529_v42  ;;  %v1845_v40 = vpop.permute.xlu1 %1844  ;;  %vm596_vm14 = vcmp.lt.s32.totalorder %v2171_v33, 113  ;;  %vm3030_vm12 = vcmp.lt.s32.totalorder %v2169_v30, 113  ;;  %vm595_vm11 = vcmp.lt.s32.totalorder %v2173_v36, 113 }
 0x14d   :  { %v1847_v47 = vunpack.i.h.bf16 %v1845_v40  ;;  %v1846_v48 = vunpack.i.l.bf16 %v1845_v40  ;;  %vm2623_vm5 = vmpackc.low %vm3030_vm12, %vm561_vm10  ;;  %vm3033_vm13 = vcmp.lt.s32.totalorder %v2164_v26, 113  ;;  %vm3034_vm15 = vcmp.lt.s32.totalorder %v2164_v26, 114 }
 0x14e   :  { %v591_v42 = vsel %vm3033_vm13, %v1841_v31, %v1842_v28  ;;  %v559_v50 = vsel %vm3034_vm15, %v1837_v32, %v1831_v38  ;;  %vm3035_vm9 = vmmov %vm3034_vm15 }
 0x14f   :  { %v556_v56 = vsel %vm3035_vm9, %v1836_v34, %v1837_v32  ;;  %vm3036_vm2 = vmmov %vm3035_vm9  ;;  %vm3044_vm9 = vcmp.lt.s32.totalorder %v2171_v33, 114  ;;  %v613_v33 = vld [vmem:[%s2908_s1] sm:$0xff] }
 0x150   :  { %vm3037_vm10 = vmmov %vm3033_vm13 }
 0x151   :  { %vm2639_vm12 = vmpackc.low %vm3037_vm10, %vm3036_vm2 }
 0x152   :  { %vm3040_vm0 = vmmov %vm3036_vm2 }
 0x153   :  { %v557_v57 = vsel %vm3040_vm0, %v1832_v35, %v1836_v34  ;;  %vm3041_vm3 = vmmov %vm3037_vm10 }
 0x154   :  { %v592_v58 = vsel %vm3041_vm3, %v1847_v47, %v1841_v31  ;;  %vm3042_vm13 = vmmov %vm3041_vm3 }
 0x155   :  { %v589_v59 = vsel %vm3042_vm13, %v1846_v48, %v1847_v47  ;;  %vm3043_vm15 = vmmov %vm3041_vm3  ;;  %v1575_v5 = vpack.c.bf16 %v592_v58, %v559_v50  ;;  %vm3048_vm3 = vcmp.lt.s32.totalorder %v2173_v36, 114  ;;  %v681_v36 = vpop.permute.xlu0 %680 }
 0x156   :  { %v590_v61 = vsel %vm3043_vm15, %v1842_v28, %v1846_v48  ;;  %vm2653_vm1 = vmpackc.low %vm596_vm14, %vm3044_vm9  ;;  %v1578_v7 = vpack.c.bf16 %v589_v59, %v556_v56  ;;  %vm3055_vm15 = vcmp.lt.s32.totalorder %v2164_v26, 126 }
 0x157   :  { %vm3047_vm2 = vmmov %vm3040_vm0  ;;  %v1527_v2 = vpack.c.bf16 %v590_v61, %v557_v57  ;;  %1577 = vmatprep.subr.msk.bf16.mxu1 %vm2653_vm1, %v1575_v5 }
 0x158   :  { %v558_v1 = vsel %vm3047_vm2, %v1831_v38, %v1832_v35  ;;  %vm2661_vm0 = vmpackc.low %vm595_vm11, %vm3048_vm3  ;;  %vm3051_vm11 = vcmp.lt.s32.totalorder %v2164_v26, 127 }
 0x159   :  { %v1530_v10 = vpack.c.bf16 %v591_v42, %v558_v1  ;;  %1529 = vmatprep.subr.msk.bf16.mxu0 %vm2623_vm5, %v1527_v2  ;;  %1580 = vmatpush1.bf16.msk.msra.mxu1 %vm2661_vm0, %v1578_v7  ;;  %vm3052_vm14 = vmmov %vm3051_vm11 }
 0x15a   :  { %vm3053_vm10 = vmmov %vm3051_vm11 }
 0x15b   :  { %1532 = vmatpush1.bf16.msk.msra.mxu0 %vm2639_vm12, %v1530_v10  ;;  %vm3054_vm13 = vmmov %vm3053_vm10 }
 0x15c   :  { %819 = vmatmul.mubr.f32.vlgmr.msra.gmra.mrb[0].mxu1 %v613_v33 }
 0x15d   :  { %1337 = vmatprep.mubr.f32.mxu1 %v2063_v24 }
 0x15e   :  { %748 = vmatmul.mubr.f32.vlgmr.msra.gmra.mrb[0].mxu0 %v613_v33 }
 0x15f   :  { %1266 = vmatprep.mubr.f32.mxu0 %v2063_v24 }
 0x22f   :  { %v820_v14 = vpop.f32.mrb[0].mxu1 }
 0x230   :  { %v821_v17 = vadd.f32 %v820_v14, %v681_v36  ;;  %v822_v22 = vpop.f32.mrb[1].mxu1 }
 0x231   :  { %v749_v11 = vpop.f32.mrb[0].mxu0  ;;  %v823_v28 = vadd.f32 %v822_v22, %v681_v36 }
 0x232   :  { %v750_v15 = vadd.f32 %v749_v11, %v681_v36  ;;  %v751_v19 = vpop.f32.mrb[1].mxu0  ;;  %v827_v32 = vmax.f32 %v821_v17, 0.0 }
 0x233   :  { %v752_v27 = vadd.f32 %v751_v19, %v681_v36  ;;  %v828_v35 = vmax.f32 %v823_v28, 0.0 }
 0x234   :  { %v825_v31 = vmax.f32 %v750_v15, 0.0 }
 0x235   :  { %v826_v34 = vmax.f32 %v752_v27, 0.0  ;;  %v1853_v38 = vpack.i.bf16 %v828_v35, %v827_v32 }
 0x237   :  { %v1848_v40 = vpack.i.bf16 %v826_v34, %v825_v31  ;;  %1854 = vrot.lane.b32.xlu0 %v1853_v38, %s2049_s5 }
 0x239   :  { %1849 = vrot.lane.b32.xlu1 %v1848_v40, %s2049_s5 }
 0x23b   :  { %1864 = vrot.lane.b32.xlu0 %v1853_v38, %s2048_s0 }
 0x23d   :  { %1859 = vrot.lane.b32.xlu1 %v1848_v40, %s2048_s0 }
 0x23f   :  { %1874 = vrot.lane.b32.xlu0 %v1853_v38, %s2050_s6 }
 0x241   :  { %1869 = vrot.lane.b32.xlu1 %v1848_v40, %s2050_s6 }
 0x243   :  { %1884 = vrot.lane.b32.xlu0 %v1853_v38, %s2051_s7 }
 0x245   :  { %1879 = vrot.lane.b32.xlu1 %v1848_v40, %s2051_s7 }
 0x247   :  { %1894 = vrot.lane.b32.xlu0 %v1853_v38, %s2052_s8 }
 0x249   :  { %1889 = vrot.lane.b32.xlu1 %v1848_v40, %s2052_s8 }
 0x24b   :  { %1904 = vrot.lane.b32.xlu0 %v1853_v38, %s2053_s9 }
 0x24d   :  { %1899 = vrot.lane.b32.xlu1 %v1848_v40, %s2053_s9 }
 0x24f   :  { %1914 = vrot.lane.b32.xlu0 %v1853_v38, %s2054_s10 }
 0x251   :  { %1909 = vrot.lane.b32.xlu1 %v1848_v40, %s2054_s10 }
 0x253   :  { %1924 = vrot.lane.b32.xlu0 %v1853_v38, %s2055_s11 }
 0x255   :  { %1919 = vrot.lane.b32.xlu1 %v1848_v40, %s2055_s11 }
 0x257   :  { %1934 = vrot.lane.b32.xlu0 %v1853_v38, %s2056_s12 }
 0x259   :  { %1929 = vrot.lane.b32.xlu1 %v1848_v40, %s2056_s12 }
 0x25b   :  { %1944 = vrot.lane.b32.xlu0 %v1853_v38, %s2057_s13 }
 0x25d   :  { %1939 = vrot.lane.b32.xlu1 %v1848_v40, %s2057_s13 }
 0x25f   :  { %1954 = vrot.lane.b32.xlu0 %v1853_v38, %s2058_s14 }
 0x261   :  { %1949 = vrot.lane.b32.xlu1 %v1848_v40, %s2058_s14 }
 0x263   :  { %1964 = vrot.lane.b32.xlu0 %v1853_v38, %s2059_s15 }
 0x265   :  { %1959 = vrot.lane.b32.xlu1 %v1848_v40, %s2059_s15 }
 0x267   :  { %1974 = vrot.lane.b32.xlu0 %v1853_v38, %s2060_s16 }
 0x269   :  { %1969 = vrot.lane.b32.xlu1 %v1848_v40, %s2060_s16 }
 0x26b   :  { %1984 = vrot.lane.b32.xlu0 %v1853_v38, %s2061_s17 }
 0x26d   :  { %1979 = vrot.lane.b32.xlu1 %v1848_v40, %s2061_s17 }
 0x26f   :  { %1994 = vrot.lane.b32.xlu0 %v1853_v38, %s2062_s18 }
 0x271   :  { %1989 = vrot.lane.b32.xlu1 %v1848_v40, %s2062_s18 }
 0x2a9   :  { %v1855_v24 = vpop.permute.xlu0 %1854 }
 0x2aa   :  { %v1857_v48 = vunpack.i.h.bf16 %v1855_v24  ;;  %v1856_v42 = vunpack.i.l.bf16 %v1855_v24 }
 0x2ab   :  { %v1850_v47 = vpop.permute.xlu1 %1849 }
 0x2ac   :  { %v1852_v50 = vunpack.i.h.bf16 %v1850_v47  ;;  %v1851_v56 = vunpack.i.l.bf16 %v1850_v47  ;;  %v841_v57 = vsel %vm3051_vm11, %v1856_v42, %v1857_v48  ;;  %vm3063_vm11 = vnez %v2956_v4 }
 0x2ad   :  { %v1632_v1 = vpack.c.bf16 %v841_v57, %v827_v32  ;;  %v1865_v10 = vpop.permute.xlu0 %1864 }
 0x2ae   :  { %v842_v58 = vsel %vm3052_vm14, %v1852_v50, %v1856_v42  ;;  %v843_v59 = vsel %vm3053_vm10, %v1851_v56, %v1852_v50  ;;  %v844_v61 = vsel %vm3054_vm13, %v1857_v48, %v1851_v56  ;;  %v1867_v36 = vunpack.i.h.bf16 %v1865_v10 }
 0x2af   :  { %v1581_v2 = vpack.c.bf16 %v842_v58, %v826_v34  ;;  %v1584_v5 = vpack.c.bf16 %v843_v59, %v825_v31  ;;  %v1629_v7 = vpack.c.bf16 %v844_v61, %v828_v35  ;;  %v1860_v33 = vpop.permute.xlu1 %1859  ;;  %v1866_v11 = vunpack.i.l.bf16 %v1865_v10 }
 0x2b0   :  { %v1862_v14 = vunpack.i.h.bf16 %v1860_v33  ;;  %v1861_v15 = vunpack.i.l.bf16 %v1860_v33  ;;  %vm3064_vm14 = vnez %v2958_v9  ;;  %vm3065_vm10 = vnez %v2960_v16 }
 0x2b1   :  { %1583 = vmatprep.subr.msk.bf16.mxu0 %vm2179_vm4, %v1581_v2  ;;  %1631 = vmatprep.subr.msk.bf16.mxu1 %vm2191_vm6, %v1629_v7  ;;  %v1875_v17 = vpop.permute.xlu0 %1874  ;;  %v861_v32 = vsel %vm3055_vm15, %v1866_v11, %v1867_v36  ;;  %vm3056_vm4 = vmmov %vm3055_vm15  ;;  %vm3066_vm13 = vnez %v2962_v18  ;;  %vm3067_vm15 = vcmp.lt.s32.totalorder %v2164_v26, 124 }
 0x2b2   :  { %1586 = vmatpush1.bf16.msk.msra.mxu0 %vm2206_vm7, %v1584_v5  ;;  %1634 = vmatpush1.bf16.msk.msra.mxu1 %vm2215_vm8, %v1632_v1  ;;  %v1877_v22 = vunpack.i.h.bf16 %v1875_v17  ;;  %v1876_v27 = vunpack.i.l.bf16 %v1875_v17  ;;  %v862_v41 = vsel %vm3056_vm4, %v1862_v14, %v1866_v11  ;;  %vm3057_vm6 = vmmov %vm3056_vm4  ;;  %vm3059_vm8 = vcmp.lt.s32.totalorder %v2164_v26, 125 }
 0x2b3   :  { %v1870_v19 = vpop.permute.xlu1 %1869  ;;  %v863_v45 = vsel %vm3057_vm6, %v1861_v15, %v1862_v14  ;;  %vm3058_vm7 = vmmov %vm3056_vm4 }
 0x2b4   :  { %v1872_v28 = vunpack.i.h.bf16 %v1870_v19  ;;  %v1871_v31 = vunpack.i.l.bf16 %v1870_v19  ;;  %v864_v51 = vsel %vm3058_vm7, %v1867_v36, %v1861_v15  ;;  %v881_v54 = vsel %vm3059_vm8, %v1876_v27, %v1877_v22  ;;  %vm3060_vm9 = vmmov %vm3059_vm8 }
 0x2b5   :  { %vm3061_vm2 = vmmov %vm3059_vm8  ;;  %v1638_v40 = vpack.c.bf16 %v881_v54, %v861_v32  ;;  %v1885_v42 = vpop.permute.xlu0 %1884  ;;  %vm3071_vm8 = vcmp.lt.s32.totalorder %v2164_v26, 123 }
 0x2b6   :  { %v882_v34 = vsel %vm3060_vm9, %v1872_v28, %v1876_v27  ;;  %v883_v35 = vsel %vm3061_vm2, %v1871_v31, %v1872_v28  ;;  %vm3062_vm3 = vmmov %vm3061_vm2  ;;  %v1887_v56 = vunpack.i.h.bf16 %v1885_v42  ;;  %v1886_v57 = vunpack.i.l.bf16 %v1885_v42 }
 0x2b7   :  { %v884_v38 = vsel %vm3062_vm3, %v1877_v22, %v1871_v31  ;;  %v1587_v24 = vpack.c.bf16 %v882_v34, %v862_v41  ;;  %v1590_v47 = vpack.c.bf16 %v883_v35, %v863_v45  ;;  %v1880_v50 = vpop.permute.xlu1 %1879  ;;  %vm3068_vm4 = vmmov %vm3067_vm15 }
 0x2b8   :  { %v1635_v48 = vpack.c.bf16 %v884_v38, %v864_v51  ;;  %v1882_v58 = vunpack.i.h.bf16 %v1880_v50  ;;  %v1881_v59 = vunpack.i.l.bf16 %v1880_v50  ;;  %v901_v33 = vsel %vm3067_vm15, %v1886_v57, %v1887_v56  ;;  %vm3069_vm6 = vmmov %vm3068_vm4 }
 0x2b9   :  { %1589 = vmatprep.subr.msk.bf16.mxu0 %vm3063_vm11, %v1587_v24  ;;  %v1895_v61 = vpop.permute.xlu0 %1894  ;;  %vm3070_vm7 = vmmov %vm3068_vm4  ;;  %vm3075_vm11 = vnez %v2964_v37  ;;  %vm3079_vm15 = vcmp.lt.s32.totalorder %v2164_v26, 122 }
 0x2ba   :  { %1637 = vmatprep.subr.msk.bf16.mxu1 %vm3064_vm14, %v1635_v48  ;;  %1592 = vmatpush1.bf16.msk.msra.mxu0 %vm3065_vm10, %v1590_v47  ;;  %v1897_v2 = vunpack.i.h.bf16 %v1895_v61  ;;  %v1896_v5 = vunpack.i.l.bf16 %v1895_v61  ;;  %v902_v4 = vsel %vm3068_vm4, %v1882_v58, %v1886_v57  ;;  %v903_v9 = vsel %vm3069_vm6, %v1881_v59, %v1882_v58  ;;  %vm3072_vm9 = vmmov %vm3071_vm8 }
 0x2bb   :  { %1640 = vmatpush1.bf16.msk.msra.mxu1 %vm3066_vm13, %v1638_v40  ;;  %v1890_v1 = vpop.permute.xlu1 %1889  ;;  %v904_v16 = vsel %vm3070_vm7, %v1887_v56, %v1881_v59  ;;  %vm3073_vm2 = vmmov %vm3071_vm8  ;;  %vm3076_vm14 = vnez %v2967_v43  ;;  %vm3077_vm10 = vnez %v2969_v52  ;;  %vm3078_vm13 = vnez %v2972_v55 }
 0x2bc   :  { %v1892_v7 = vunpack.i.h.bf16 %v1890_v1  ;;  %v1891_v10 = vunpack.i.l.bf16 %v1890_v1  ;;  %v921_v18 = vsel %vm3071_vm8, %v1896_v5, %v1897_v2  ;;  %vm3074_vm3 = vmmov %vm3073_vm2  ;;  %vm3083_vm8 = vcmp.lt.s32.totalorder %v2164_v26, 121 }
 0x2bd   :  { %v1644_v15 = vpack.c.bf16 %v921_v18, %v901_v33  ;;  %v1905_v27 = vpop.permute.xlu0 %1904  ;;  %vm3080_vm4 = vmmov %vm3079_vm15 }
 0x2be   :  { %v922_v36 = vsel %vm3072_vm9, %v1892_v7, %v1896_v5  ;;  %v923_v11 = vsel %vm3073_vm2, %v1891_v10, %v1892_v7  ;;  %v924_v14 = vsel %vm3074_vm3, %v1897_v2, %v1891_v10  ;;  %v1907_v31 = vunpack.i.h.bf16 %v1905_v27  ;;  %vm3081_vm6 = vmmov %vm3080_vm4 }
 0x2bf   :  { %v1593_v17 = vpack.c.bf16 %v922_v36, %v902_v4  ;;  %v1596_v19 = vpack.c.bf16 %v923_v11, %v903_v9  ;;  %v1641_v22 = vpack.c.bf16 %v924_v14, %v904_v16  ;;  %v1900_v28 = vpop.permute.xlu1 %1899  ;;  %v1906_v32 = vunpack.i.l.bf16 %v1905_v27  ;;  %vm3082_vm7 = vmmov %vm3080_vm4 }
 0x2c0   :  { %v1902_v41 = vunpack.i.h.bf16 %v1900_v28  ;;  %v1901_v45 = vunpack.i.l.bf16 %v1900_v28  ;;  %vm3084_vm9 = vmmov %vm3083_vm8 }
 0x2c1   :  { %1595 = vmatprep.subr.msk.bf16.mxu0 %vm3075_vm11, %v1593_v17  ;;  %1643 = vmatprep.subr.msk.bf16.mxu1 %vm3076_vm14, %v1641_v22  ;;  %v1915_v51 = vpop.permute.xlu0 %1914  ;;  %v941_v24 = vsel %vm3079_vm15, %v1906_v32, %v1907_v31  ;;  %vm3085_vm2 = vmmov %vm3083_vm8  ;;  %vm3087_vm11 = vnez %v2977_v6  ;;  %vm3088_vm14 = vnez %v2982_v12  ;;  %vm3091_vm15 = vcmp.lt.s32.totalorder %v2164_v26, 120 }
 0x2c2   :  { %1598 = vmatpush1.bf16.msk.msra.mxu0 %vm3077_vm10, %v1596_v19  ;;  %1646 = vmatpush1.bf16.msk.msra.mxu1 %vm3078_vm13, %v1644_v15  ;;  %v1917_v34 = vunpack.i.h.bf16 %v1915_v51  ;;  %v1916_v35 = vunpack.i.l.bf16 %v1915_v51  ;;  %v942_v37 = vsel %vm3080_vm4, %v1902_v41, %v1906_v32  ;;  %v943_v43 = vsel %vm3081_vm6, %v1901_v45, %v1902_v41  ;;  %vm3086_vm3 = vmmov %vm3085_vm2 }
 0x2c3   :  { %v1910_v54 = vpop.permute.xlu1 %1909  ;;  %v944_v52 = vsel %vm3082_vm7, %v1907_v31, %v1901_v45  ;;  %vm3089_vm10 = vnez %v2985_v21  ;;  %vm3090_vm13 = vnez %v2988_v23  ;;  %vm3092_vm4 = vmmov %vm3091_vm15 }
 0x2c4   :  { %v1912_v38 = vunpack.i.h.bf16 %v1910_v54  ;;  %v1911_v40 = vunpack.i.l.bf16 %v1910_v54  ;;  %v961_v55 = vsel %vm3083_vm8, %v1916_v35, %v1917_v34  ;;  %vm3093_vm6 = vmmov %vm3092_vm4  ;;  %vm3095_vm8 = vcmp.lt.s32.totalorder %v2164_v26, 119 }
 0x2c5   :  { %v1650_v50 = vpack.c.bf16 %v961_v55, %v941_v24  ;;  %v1925_v59 = vpop.permute.xlu0 %1924  ;;  %vm3094_vm7 = vmmov %vm3092_vm4 }
 0x2c6   :  { %v962_v47 = vsel %vm3084_vm9, %v1912_v38, %v1916_v35  ;;  %v963_v48 = vsel %vm3085_vm2, %v1911_v40, %v1912_v38  ;;  %v964_v42 = vsel %vm3086_vm3, %v1917_v34, %v1911_v40  ;;  %v1927_v1 = vunpack.i.h.bf16 %v1925_v59  ;;  %vm3096_vm9 = vmmov %vm3095_vm8 }
 0x2c7   :  { %v1599_v56 = vpack.c.bf16 %v962_v47, %v942_v37  ;;  %v1602_v57 = vpack.c.bf16 %v963_v48, %v943_v43  ;;  %v1647_v58 = vpack.c.bf16 %v964_v42, %v944_v52  ;;  %v1920_v61 = vpop.permute.xlu1 %1919  ;;  %v1926_v2 = vunpack.i.l.bf16 %v1925_v59  ;;  %vm3097_vm2 = vmmov %vm3095_vm8 }
 0x2c8   :  { %v1922_v5 = vunpack.i.h.bf16 %v1920_v61  ;;  %v1921_v7 = vunpack.i.l.bf16 %v1920_v61  ;;  %vm3098_vm3 = vmmov %vm3097_vm2 }
 0x2c9   :  { %1601 = vmatprep.subr.msk.bf16.mxu0 %vm3087_vm11, %v1599_v56  ;;  %1649 = vmatprep.subr.msk.bf16.mxu1 %vm3088_vm14, %v1647_v58  ;;  %v1935_v10 = vpop.permute.xlu0 %1934  ;;  %v981_v36 = vsel %vm3091_vm15, %v1926_v2, %v1927_v1  ;;  %vm3099_vm11 = vnez %v2992_v46  ;;  %vm3100_vm14 = vnez %v2995_v53  ;;  %vm3103_vm15 = vcmp.lt.s32.totalorder %v2164_v26, 118 }
 0x2ca   :  { %1604 = vmatpush1.bf16.msk.msra.mxu0 %vm3089_vm10, %v1602_v57  ;;  %1652 = vmatpush1.bf16.msk.msra.mxu1 %vm3090_vm13, %v1650_v50  ;;  %v1937_v4 = vunpack.i.h.bf16 %v1935_v10  ;;  %v1936_v9 = vunpack.i.l.bf16 %v1935_v10  ;;  %v982_v6 = vsel %vm3092_vm4, %v1922_v5, %v1926_v2  ;;  %v983_v12 = vsel %vm3093_vm6, %v1921_v7, %v1922_v5  ;;  %vm3104_vm4 = vmmov %vm3103_vm15 }
 0x2cb   :  { %v1930_v33 = vpop.permute.xlu1 %1929  ;;  %v984_v21 = vsel %vm3094_vm7, %v1927_v1, %v1921_v7  ;;  %vm3101_vm10 = vnez %v2997_v62  ;;  %vm3102_vm13 = vnez %v3000_v0  ;;  %vm3105_vm6 = vmmov %vm3104_vm4 }
 0x2cc   :  { %v1932_v16 = vunpack.i.h.bf16 %v1930_v33  ;;  %v1931_v18 = vunpack.i.l.bf16 %v1930_v33  ;;  %v1001_v23 = vsel %vm3095_vm8, %v1936_v9, %v1937_v4  ;;  %vm3106_vm7 = vmmov %vm3104_vm4  ;;  %vm3107_vm8 = vcmp.lt.s32.totalorder %v2164_v26, 117 }
 0x2cd   :  { %v1656_v17 = vpack.c.bf16 %v1001_v23, %v981_v36  ;;  %v1945_v28 = vpop.permute.xlu0 %1944 }
 0x2ce   :  { %v1002_v11 = vsel %vm3096_vm9, %v1932_v16, %v1936_v9  ;;  %v1003_v14 = vsel %vm3097_vm2, %v1931_v18, %v1932_v16  ;;  %v1004_v15 = vsel %vm3098_vm3, %v1937_v4, %v1931_v18  ;;  %v1947_v32 = vunpack.i.h.bf16 %v1945_v28  ;;  %vm3108_vm9 = vmmov %vm3107_vm8 }
 0x2cf   :  { %v1605_v19 = vpack.c.bf16 %v1002_v11, %v982_v6  ;;  %v1608_v22 = vpack.c.bf16 %v1003_v14, %v983_v12  ;;  %v1653_v27 = vpack.c.bf16 %v1004_v15, %v984_v21  ;;  %v1940_v31 = vpop.permute.xlu1 %1939  ;;  %v1946_v41 = vunpack.i.l.bf16 %v1945_v28  ;;  %vm3109_vm2 = vmmov %vm3107_vm8 }
 0x2d0   :  { %v1942_v45 = vunpack.i.h.bf16 %v1940_v31  ;;  %v1941_v51 = vunpack.i.l.bf16 %v1940_v31  ;;  %vm3110_vm3 = vmmov %vm3109_vm2 }
 0x2d1   :  { %1607 = vmatprep.subr.msk.bf16.mxu0 %vm3099_vm11, %v1605_v19  ;;  %1655 = vmatprep.subr.msk.bf16.mxu1 %vm3100_vm14, %v1653_v27  ;;  %v1955_v54 = vpop.permute.xlu0 %1954  ;;  %v1021_v37 = vsel %vm3103_vm15, %v1946_v41, %v1947_v32  ;;  %vm3111_vm11 = vnez %v3005_v20  ;;  %vm3112_vm14 = vnez %v3010_v29  ;;  %vm3115_vm15 = vcmp.lt.s32.totalorder %v2164_v26, 116 }
 0x2d2   :  { %1610 = vmatpush1.bf16.msk.msra.mxu0 %vm3101_vm10, %v1608_v22  ;;  %1658 = vmatpush1.bf16.msk.msra.mxu1 %vm3102_vm13, %v1656_v17  ;;  %v1957_v35 = vunpack.i.h.bf16 %v1955_v54  ;;  %v1956_v38 = vunpack.i.l.bf16 %v1955_v54  ;;  %v1022_v46 = vsel %vm3104_vm4, %v1942_v45, %v1946_v41  ;;  %v1023_v53 = vsel %vm3105_vm6, %v1941_v51, %v1942_v45  ;;  %vm3116_vm4 = vmmov %vm3115_vm15 }
 0x2d3   :  { %v1950_v34 = vpop.permute.xlu1 %1949  ;;  %v1024_v62 = vsel %vm3106_vm7, %v1947_v32, %v1941_v51  ;;  %vm3113_vm10 = vnez %v3013_v39  ;;  %vm3114_vm13 = vnez %v3016_v44  ;;  %vm3117_vm6 = vmmov %vm3116_vm4 }
 0x2d4   :  { %v1952_v40 = vunpack.i.h.bf16 %v1950_v34  ;;  %v1951_v24 = vunpack.i.l.bf16 %v1950_v34  ;;  %v1041_v0 = vsel %vm3107_vm8, %v1956_v38, %v1957_v35  ;;  %vm3118_vm7 = vmmov %vm3116_vm4  ;;  %vm3119_vm8 = vcmp.lt.s32.totalorder %v2164_v26, 115 }
 0x2d5   :  { %v1662_v47 = vpack.c.bf16 %v1041_v0, %v1021_v37  ;;  %v1965_v56 = vpop.permute.xlu0 %1964 }
 0x2d6   :  { %v1042_v43 = vsel %vm3108_vm9, %v1952_v40, %v1956_v38  ;;  %v1043_v52 = vsel %vm3109_vm2, %v1951_v24, %v1952_v40  ;;  %v1044_v55 = vsel %vm3110_vm3, %v1957_v35, %v1951_v24  ;;  %v1967_v58 = vunpack.i.h.bf16 %v1965_v56  ;;  %vm3120_vm9 = vmmov %vm3119_vm8 }
 0x2d7   :  { %v1611_v48 = vpack.c.bf16 %v1042_v43, %v1022_v46  ;;  %v1614_v42 = vpack.c.bf16 %v1043_v52, %v1023_v53  ;;  %v1659_v50 = vpack.c.bf16 %v1044_v55, %v1024_v62  ;;  %v1960_v57 = vpop.permute.xlu1 %1959  ;;  %v1966_v59 = vunpack.i.l.bf16 %v1965_v56  ;;  %vm3121_vm2 = vmmov %vm3119_vm8  ;;  %v1198_v46 = vld [vmem:[#allocation4] sm:$0xff]  ;;  %v1200_v53 = vld [vmem:[#allocation4 + $0x10] sm:$0xff] }
 0x2d8   :  { %v1962_v61 = vunpack.i.h.bf16 %v1960_v57  ;;  %v1961_v1 = vunpack.i.l.bf16 %v1960_v57  ;;  %vm3122_vm3 = vmmov %vm3121_vm2  ;;  %v1199_v62 = vld [vmem:[#allocation4 + $0x8] sm:$0xff] }
 0x2d9   :  { %1613 = vmatprep.subr.msk.bf16.mxu0 %vm3111_vm11, %v1611_v48  ;;  %1661 = vmatprep.subr.msk.bf16.mxu1 %vm3112_vm14, %v1659_v50  ;;  %v1975_v2 = vpop.permute.xlu0 %1974  ;;  %v1061_v9 = vsel %vm3115_vm15, %v1966_v59, %v1967_v58  ;;  %vm3123_vm11 = vnez %v3022_v3  ;;  %vm3124_vm14 = vnez %v3026_v13  ;;  %vm3127_vm15 = vcmp.lt.s32.totalorder %v2164_v26, 114 }
 0x2da   :  { %1616 = vmatpush1.bf16.msk.msra.mxu0 %vm3113_vm10, %v1614_v42  ;;  %1664 = vmatpush1.bf16.msk.msra.mxu1 %vm3114_vm13, %v1662_v47  ;;  %v1977_v7 = vunpack.i.h.bf16 %v1975_v2  ;;  %v1976_v10 = vunpack.i.l.bf16 %v1975_v2  ;;  %v1062_v20 = vsel %vm3116_vm4, %v1962_v61, %v1966_v59  ;;  %v1063_v29 = vsel %vm3117_vm6, %v1961_v1, %v1962_v61  ;;  %vm3128_vm4 = vmmov %vm3127_vm15 }
 0x2db   :  { %v1970_v5 = vpop.permute.xlu1 %1969  ;;  %v1064_v39 = vsel %vm3118_vm7, %v1967_v58, %v1961_v1  ;;  %vm3125_vm10 = vnez %v3018_v63  ;;  %vm3126_vm13 = vnez %v3029_v25  ;;  %vm3129_vm6 = vmmov %vm3128_vm4 }
 0x2dc   :  { %v1972_v33 = vunpack.i.h.bf16 %v1970_v5  ;;  %v1971_v4 = vunpack.i.l.bf16 %v1970_v5  ;;  %v1081_v44 = vsel %vm3119_vm8, %v1976_v10, %v1977_v7  ;;  %vm3130_vm7 = vmmov %vm3128_vm4  ;;  %vm3131_vm8 = vcmp.lt.s32.totalorder %v2164_v26, 113  ;;  %v1133_v26 = vld [vmem:[%s2909_s2] sm:$0xff]  ;;  %s2020_s2 = scalar_lea.vmem %s1355_s24, 512 }
 0x2dd   :  { %v1668_v6 = vpack.c.bf16 %v1081_v44, %v1061_v9  ;;  %v1985_v11 = vpop.permute.xlu0 %1984  ;;  %p2021_p8 = scmp.ne.s32.totalorder %s1355_s24, %s2020_s2  ;;  %p2026_p10 = scmp.lt.s32.totalorder %s2020_s2, %s2020_s2 }
 0x2de   :  { %v1082_v16 = vsel %vm3120_vm9, %v1972_v33, %v1976_v10  ;;  %v1083_v18 = vsel %vm3121_vm2, %v1971_v4, %v1972_v33  ;;  %v1084_v36 = vsel %vm3122_vm3, %v1977_v7, %v1971_v4  ;;  %v1987_v15 = vunpack.i.h.bf16 %v1985_v11  ;;  %vm3132_vm9 = vmmov %vm3131_vm8 }
 0x2df   :  { %v1617_v12 = vpack.c.bf16 %v1082_v16, %v1062_v20  ;;  %v1620_v21 = vpack.c.bf16 %v1083_v18, %v1063_v29  ;;  %v1665_v23 = vpack.c.bf16 %v1084_v36, %v1064_v39  ;;  %v1980_v14 = vpop.permute.xlu1 %1979  ;;  %v1986_v17 = vunpack.i.l.bf16 %v1985_v11  ;;  %vm3133_vm2 = vmmov %vm3131_vm8  ;;  %p2027_p11 = por %p2026_p10, %p2025_p9 }
 0x2e0   :  { %v1982_v19 = vunpack.i.h.bf16 %v1980_v14  ;;  %v1981_v22 = vunpack.i.l.bf16 %v1980_v14  ;;  %vm3134_vm3 = vmmov %vm3133_vm2 }
 0x2e1   :  { %1619 = vmatprep.subr.msk.bf16.mxu0 %vm3123_vm11, %v1617_v12  ;;  %1667 = vmatprep.subr.msk.bf16.mxu1 %vm3124_vm14, %v1665_v23  ;;  %v1995_v27 = vpop.permute.xlu0 %1994  ;;  %v1101_v51 = vsel %vm3127_vm15, %v1986_v17, %v1987_v15  ;;  %p2028_p12 = pnand %p2027_p11, %p2021_p8 }
 0x2e2   :  { %1622 = vmatpush1.bf16.msk.msra.mxu0 %vm3125_vm10, %v1620_v21  ;;  %1670 = vmatpush1.bf16.msk.msra.mxu1 %vm3126_vm13, %v1668_v6  ;;  %v1997_v31 = vunpack.i.h.bf16 %v1995_v27  ;;  %v1996_v32 = vunpack.i.l.bf16 %v1995_v27  ;;  %v1102_v3 = vsel %vm3128_vm4, %v1982_v19, %v1986_v17  ;;  %v1103_v13 = vsel %vm3129_vm6, %v1981_v22, %v1982_v19 }
 0x2e3   :  { %v1990_v28 = vpop.permute.xlu1 %1989  ;;  %v1104_v63 = vsel %vm3130_vm7, %v1987_v15, %v1981_v22 }
 0x2e4   :  { %v1992_v41 = vunpack.i.h.bf16 %v1990_v28  ;;  %v1991_v45 = vunpack.i.l.bf16 %v1990_v28  ;;  %v1121_v25 = vsel %vm3131_vm8, %v1996_v32, %v1997_v31 }
 0x2e5   :  { %v1674_v38 = vpack.c.bf16 %v1121_v25, %v1101_v51 }
 0x2e6   :  { %v1122_v54 = vsel %vm3132_vm9, %v1992_v41, %v1996_v32  ;;  %v1123_v34 = vsel %vm3133_vm2, %v1991_v45, %v1992_v41  ;;  %v1124_v35 = vsel %vm3134_vm3, %v1997_v31, %v1991_v45 }
 0x2e7   :  { %v1623_v40 = vpack.c.bf16 %v1122_v54, %v1102_v3  ;;  %v1626_v24 = vpack.c.bf16 %v1123_v34, %v1103_v13  ;;  %v1671_v37 = vpack.c.bf16 %v1124_v35, %v1104_v63 }
 0x2e9   :  { %1625 = vmatprep.subr.msk.bf16.mxu0 %vm2623_vm5, %v1623_v40  ;;  %1673 = vmatprep.subr.msk.bf16.mxu1 %vm2653_vm1, %v1671_v37 }
 0x2ea   :  { %1628 = vmatpush1.bf16.msk.msra.mxu0 %vm2639_vm12, %v1626_v24  ;;  %1676 = vmatpush1.bf16.msk.msra.mxu1 %vm2661_vm0, %v1674_v38 }
 0x2ed   :  { %1267 = vmatmul.mubr.f32.vlgmr.msra.gmra.mrb[2].mxu0 %v1133_v26  ;;  %1338 = vmatmul.mubr.f32.vlgmr.msra.gmra.mrb[2].mxu1 %v1133_v26 }
 0x3c0   :  { %v1268_v60 = vpop.f32.mrb[2].mxu0  ;;  %v1339_v0 = vpop.f32.mrb[2].mxu1 }
 0x3c1   :  { %v1269_v43 = vadd.f32 %v1268_v60, %v1198_v46  ;;  %v1340_v30 = vadd.f32 %v1339_v0, %v1200_v53  ;;  %v1270_v52 = vpop.f32.mrb[3].mxu0  ;;  %v1341_v55 = vpop.f32.mrb[3].mxu1 }
 0x3c2   :  { %v1271_v8 = vadd.f32 %v1270_v52, %v1199_v62  ;;  %v1342_v47 = vadd.f32 %v1341_v55, %v1201_v49 }
 0x3c3   :  { %1344 = vst [vmem:[#allocation7] sm:$0xff] %v1269_v43  ;;  %1346 = vst [vmem:[#allocation7 + $0x10] sm:$0xff] %v1340_v30 }
 0x3c4   :  { %1345 = vst [vmem:[#allocation7 + $0x8] sm:$0xff] %v1271_v8  ;;  %1347 = vst [vmem:[#allocation7 + $0x18] sm:$0xff] %v1342_v47 }
 0x3c5   :  { %2031 = shalt.err (!%p2028_p12)
}
 0x3c6   :  { %s2032_s27 = scalar_lea.hbm %s2911_s4, 512 }
 0x3c7   :  { %p2033_p13 = scmp.ne.s32.totalorder %s2911_s4, %s2032_s27  ;;  %p2036_p0 = scmp.lt.u32.totalorder %s2032_s27, %s2911_s4 }
 0x3c9   :  { %p2038_p1 = pnand %p2036_p0, %p2033_p13 }
 0x3cb   :  { %2041 = shalt.err (!%p2038_p1)
}
 0x3cc   :  { %1357 = dma.vmem_to_hbm [thread:$0]  %s1355_s24, 512, %s2911_s4, [#allocation6]  }
 0x3cd   :  { %2044 = dma.done.wait [#allocation6], 512  }
 0x3ce   :  { %2045 = vsyncadd [#allocation6], 4294966784 }
 0x3cf   :  { %1361 = vsyncpa [#allocation5], 1 }
 0x3d0   :  { %1362 = vsyncpa [#allocation6], 1 }

</bundles_post_ra>
